<compile_context>
chip_gen: v7x
topology: tpu7x:2x2x1
jax: 0.10.0
libtpu: 0.0.40
codegen_flags: <defaults>
</compile_context>

<pallas_src>
import numpy as np
import jax
import jax.numpy as jnp
from jax import lax
from jax.experimental import pallas as pl
from jax.experimental.pallas import tpu as pltpu

# ----------------------------- static config -----------------------------
INCLUDE_MEAN = True
INCLUDE_STD = False
INCLUDE_MAX = False
NUM_STATS = int(INCLUDE_MEAN) + int(INCLUDE_STD) + int(INCLUDE_MAX)
# TODO(synk): dropout > 0 at train time would need in-kernel PRNG
# (pltpu.prng_seed / stateful_bernoulli); with the module default p=0.0 it is
# the identity, so it is omitted.

# Tap offsets implied by the torch Conv2d configs of the five TDNN layers:
#   td1: Conv2d(1,F,(5,F))                 -> taps [0,1,2,3,4]
#   td2: Conv2d(1,F,(2,F), dilation=(4,1)) -> taps [0,4]
#   td3: Conv2d(1,F,(2,F), dilation=(6,1)) -> taps [0,6]
#   td4: Conv2d(1,F,(1,F))                 -> taps [0]
#   td5: Conv2d(1,F,(1,F))                 -> taps [0]
TDNN_TAPS = ((0, 1, 2, 3, 4), (0, 4), (0, 6), (0,), (0,))
TOTAL_SHRINK = sum(t[-1] for t in TDNN_TAPS)  # = 14 frames lost end-to-end


def _round_up(x, m):
    return ((x + m - 1) // m) * m


# ----------------------------- fused Pallas kernel -----------------------------
def _make_kernel(lengths, n_pad):
    """Kernel closure with the static, shape-derived utterance lengths baked in."""
    batch = len(lengths)

    def kernel(x_ref,                                       # (T_flat, F) f32
               w1, b1, w2, b2, w3, b3, w4, b4, w5, b5,      # TDNN (taps*F,F) bf16 / (1,F) f32
               mw1, mb1, mw2, mb2, mw3, mb3,                # MLP weights bf16 / biases f32
               out_ref):                                    # (B, out_size) f32
        ws = (w1, w2, w3, w4, w5)
        bs = (b1, b2, b3, b4, b5)

        # -------- TDNN stack: one fused wide-K matmul per layer over the whole
        # flattened batch slab.  Rows whose receptive field straddles an
        # utterance boundary are computed but never read by pooling below. ----
        h = x_ref[...].astype(jnp.float32)                  # (T_flat, F)
        for li, taps in enumerate(TDNN_TAPS):
            n_out = h.shape[0] - taps[-1]
            if len(taps) > 1:
                lhs = jnp.concatenate([h[off:off + n_out, :] for off in taps], axis=1)
            else:
                lhs = h[:n_out, :]
            acc = jnp.dot(lhs.astype(jnp.bfloat16), ws[li][...],
                          preferred_element_type=jnp.float32) + bs[li][...]
            # ReLU after td1..td4, not after td5 (matches the nn.Sequential).
            h = acc if li == len(TDNN_TAPS) - 1 else jnp.maximum(acc, 0.0)

        # -------- statistics pooling over each utterance's valid frames
        # (static slices / denominators; no masks, no scalar traffic). --------
        pooled_rows = []
        for b in range(batch):
            start = b * n_pad
            n_valid = lengths[b] - TOTAL_SHRINK              # Python int (static)
            hb = h[start:start + n_valid, :]                 # (n_valid, F) f32
            stats = []
            if INCLUDE_MEAN:
                stats.append(jnp.sum(hb, axis=0, keepdims=True) / float(n_valid))
            if INCLUDE_STD:
                mu = jnp.sum(hb, axis=0, keepdims=True) / float(n_valid)
                d = hb - mu
                stats.append(jnp.sqrt(jnp.sum(d * d, axis=0, keepdims=True)
                                      / float(n_valid - 1)))
            if INCLUDE_MAX:
                stats.append(jnp.max(hb, axis=0, keepdims=True))
            pooled_rows.append(jnp.concatenate(stats, axis=1))
        pooled = jnp.concatenate(pooled_rows, axis=0)        # (B, NUM_STATS*F) f32

        # -------- segment-level MLP (Dropout(p=0.0) == identity) --------
        z = jnp.dot(pooled.astype(jnp.bfloat16), mw1[...],
                    preferred_element_type=jnp.float32) + mb1[...]
        z = jnp.maximum(z, 0.0)
        z = jnp.dot(z.astype(jnp.bfloat16), mw2[...],
                    preferred_element_type=jnp.float32) + mb2[...]
        z = jnp.maximum(z, 0.0)
        z = jnp.dot(z.astype(jnp.bfloat16), mw3[...],
                    preferred_element_type=jnp.float32) + mb3[...]
        out_ref[...] = z.astype(out_ref.dtype)

    return kernel


# ----------------------------- wrapper -----------------------------
def xvector_forward(x_list, tdnn_params, mlp_params):
    """x_list: list of (N_i, F) f32 arrays -> (len(x_list), output_size) f32."""
    feat = x_list[0].shape[1]
    batch = len(x_list)
    lengths = [int(x.shape[0]) for x in x_list]
    assert all(n > TOTAL_SHRINK for n in lengths), \
        "utterance too short for the 14-frame TDNN context"
    n_pad = _round_up(max(lengths), 8)                       # sublane-aligned bucket
    t_flat = batch * n_pad

    # Flattened batch slab (B*N_pad, F); padded frames are zeros and are never
    # read by the pooling slices inside the kernel.
    x_flat = jnp.concatenate(
        [jnp.pad(x.astype(jnp.float32), ((0, n_pad - x.shape[0]), (0, 0)))
         for x in x_list], axis=0)

    # Flatten params: TDNN weights fused to (num_taps*F, F) bf16, biases f32.
    flat_args = []
    for taps, (w, bias) in zip(TDNN_TAPS, tdnn_params):
        flat_args.append(w.reshape(len(taps) * feat, feat).astype(jnp.bfloat16))
        flat_args.append(bias.astype(jnp.float32))
    mw1, mb1, mw2, mb2, mw3, mb3 = mlp_params
    out_size = mw3.shape[1]
    flat_args += [mw1.astype(jnp.bfloat16), mb1.astype(jnp.float32),
                  mw2.astype(jnp.bfloat16), mb2.astype(jnp.float32),
                  mw3.astype(jnp.bfloat16), mb3.astype(jnp.float32)]

    def whole(arr):
        # Full-array block, constant index map -> single VMEM staging.
        return pl.BlockSpec(arr.shape, lambda i: (0, 0))

    grid_spec = pltpu.PrefetchScalarGridSpec(
        num_scalar_prefetch=0,
        grid=(1,),
        in_specs=[whole(x_flat)] + [whole(a) for a in flat_args],
        out_specs=pl.BlockSpec((batch, out_size), lambda i: (0, 0)),
    )

    kernel = _make_kernel(lengths, n_pad)
    return pl.pallas_call(
        kernel,
        out_shape=jax.ShapeDtypeStruct((batch, out_size), jnp.float32),
        grid_spec=grid_spec,
        compiler_params=pltpu.CompilerParams(
            dimension_semantics=("arbitrary",)),
    )(x_flat, *flat_args)


# ----------------------------- parameter init -----------------------------
def init_params(key, feature_size, output_size):
    keys = jax.random.split(key, 16)

    def nrm(k, shape, scale=0.05):
        return scale * jax.random.normal(k, shape, dtype=jnp.float32)

    i = 0
    tdnn_params = []
    for taps in TDNN_TAPS:
        # (num_taps, F_in, F_out); equals torch Conv2d weight (F_out,1,k,F_in)
        # transposed to (k, F_in, F_out).
        w = nrm(keys[i], (len(taps), feature_size, feature_size)); i += 1
        b = nrm(keys[i], (1, feature_size)); i += 1
        tdnn_params.append((w, b))

    stats_size = NUM_STATS * feature_size
    w1 = nrm(keys[i], (stats_size, 256)); i += 1
    b1 = nrm(keys[i], (1, 256)); i += 1
    w2 = nrm(keys[i], (256, 256)); i += 1
    b2 = nrm(keys[i], (1, 256)); i += 1
    w3 = nrm(keys[i], (256, output_size)); i += 1
    b3 = nrm(keys[i], (1, output_size)); i += 1
    return tdnn_params, (w1, b1, w2, b2, w3, b3)


# ----------------------------- pure-JAX reference -----------------------------
def reference_forward(x_list, tdnn_params, mlp_params, use_bf16):
    def mm(a, w):
        if use_bf16:
            return jnp.dot(a.astype(jnp.bfloat16), w.astype(jnp.bfloat16),
                           preferred_element_type=jnp.float32)
        return jnp.dot(a, w, preferred_element_type=jnp.float32,
                       precision=lax.Precision.HIGHEST)

    pooled = []
    for x in x_list:
        h = x.astype(jnp.float32)
        for li, taps in enumerate(TDNN_TAPS):
            w, bias = tdnn_params[li]
            n_out = h.shape[0] - taps[-1]
            lhs = jnp.concatenate([h[off:off + n_out] for off in taps], axis=1)
            acc = mm(lhs, w.reshape(len(taps) * w.shape[1], w.shape[2])) + bias
            h = acc if li == len(TDNN_TAPS) - 1 else jnp.maximum(acc, 0.0)
        stats = []
        if INCLUDE_MEAN:
            stats.append(jnp.mean(h, axis=0, keepdims=True))
        if INCLUDE_STD:
            mu = jnp.mean(h, axis=0, keepdims=True)
            stats.append(jnp.sqrt(jnp.sum((h - mu) ** 2, axis=0, keepdims=True)
                                  / (h.shape[0] - 1)))
        if INCLUDE_MAX:
            stats.append(jnp.max(h, axis=0, keepdims=True))
        pooled.append(jnp.concatenate(stats, axis=1))
    pooled = jnp.concatenate(pooled, axis=0)
    mw1, mb1, mw2, mb2, mw3, mb3 = mlp_params
    z = jnp.maximum(mm(pooled, mw1) + mb1, 0.0)
    z = jnp.maximum(mm(z, mw2) + mb2, 0.0)
    return mm(z, mw3) + mb3


# ----------------------------- main -----------------------------
if __name__ == "__main__":
    FEATURE_SIZE = 32
    OUTPUT_SIZE = 16

    key = jax.random.PRNGKey(0)
    pkey, xkey = jax.random.split(key)
    tdnn_params, mlp_params = init_params(pkey, FEATURE_SIZE, OUTPUT_SIZE)

    # Variable-length "utterances" (the torch module takes a list of (N, D)).
    lengths = [24, 30, 20]  # each must exceed the 14-frame TDNN context
    xkeys = jax.random.split(xkey, len(lengths))
    x_list = [jax.random.normal(k, (n, FEATURE_SIZE), dtype=jnp.float32)
              for k, n in zip(xkeys, lengths)]

    out = xvector_forward(x_list, tdnn_params, mlp_params)
    out = jax.block_until_ready(out)
    assert out.shape == (len(lengths), OUTPUT_SIZE)

    # Primary check: kernel logic vs a reference with matching (bf16-in / f32-acc)
    # matmul precision.
    ref_bf16 = reference_forward(x_list, tdnn_params, mlp_params, use_bf16=True)
    np.testing.assert_allclose(np.asarray(out), np.asarray(ref_bf16),
                               rtol=2e-3, atol=2e-3)

    # Sanity check: bf16 MXU inputs stay close to the full-f32 forward.
    ref_f32 = reference_forward(x_list, tdnn_params, mlp_params, use_bf16=False)
    np.testing.assert_allclose(np.asarray(out), np.asarray(ref_f32),
                               rtol=5e-2, atol=5e-3)

    print("KERNEL_OK")
</pallas_src>

<mosaic_0001>
module attributes {stable_mosaic.version = 11 : i64} {
  func.func @kernel(%arg0: i32, %arg1: memref<96x32xf32, #tpu.memory_space<vmem>>, %arg2: memref<160x32xbf16, #tpu.memory_space<vmem>>, %arg3: memref<1x32xf32, #tpu.memory_space<vmem>>, %arg4: memref<64x32xbf16, #tpu.memory_space<vmem>>, %arg5: memref<1x32xf32, #tpu.memory_space<vmem>>, %arg6: memref<64x32xbf16, #tpu.memory_space<vmem>>, %arg7: memref<1x32xf32, #tpu.memory_space<vmem>>, %arg8: memref<32x32xbf16, #tpu.memory_space<vmem>>, %arg9: memref<1x32xf32, #tpu.memory_space<vmem>>, %arg10: memref<32x32xbf16, #tpu.memory_space<vmem>>, %arg11: memref<1x32xf32, #tpu.memory_space<vmem>>, %arg12: memref<32x256xbf16, #tpu.memory_space<vmem>>, %arg13: memref<1x256xf32, #tpu.memory_space<vmem>>, %arg14: memref<256x256xbf16, #tpu.memory_space<vmem>>, %arg15: memref<1x256xf32, #tpu.memory_space<vmem>>, %arg16: memref<256x16xbf16, #tpu.memory_space<vmem>>, %arg17: memref<1x16xf32, #tpu.memory_space<vmem>>, %arg18: memref<3x16xf32, #tpu.memory_space<vmem>>) attributes {dimension_semantics = [#tpu.dimension_semantics<arbitrary>], iteration_bounds = array<i64: 1>, scalar_prefetch = 0 : i64, scratch_operands = 0 : i64, tpu.core_type = #tpu.core_type<tc>, window_params = [{pipeline_mode = #tpu.pipeline_mode<synchronous>, transform_indices = @transform_0, window_bounds = array<i64: 96, 32>}, {pipeline_mode = #tpu.pipeline_mode<synchronous>, transform_indices = @transform_1, window_bounds = array<i64: 160, 32>}, {pipeline_mode = #tpu.pipeline_mode<synchronous>, transform_indices = @transform_2, window_bounds = array<i64: 1, 32>}, {pipeline_mode = #tpu.pipeline_mode<synchronous>, transform_indices = @transform_3, window_bounds = array<i64: 64, 32>}, {pipeline_mode = #tpu.pipeline_mode<synchronous>, transform_indices = @transform_4, window_bounds = array<i64: 1, 32>}, {pipeline_mode = #tpu.pipeline_mode<synchronous>, transform_indices = @transform_5, window_bounds = array<i64: 64, 32>}, {pipeline_mode = #tpu.pipeline_mode<synchronous>, transform_indices = @transform_6, window_bounds = array<i64: 1, 32>}, {pipeline_mode = #tpu.pipeline_mode<synchronous>, transform_indices = @transform_7, window_bounds = array<i64: 32, 32>}, {pipeline_mode = #tpu.pipeline_mode<synchronous>, transform_indices = @transform_8, window_bounds = array<i64: 1, 32>}, {pipeline_mode = #tpu.pipeline_mode<synchronous>, transform_indices = @transform_9, window_bounds = array<i64: 32, 32>}, {pipeline_mode = #tpu.pipeline_mode<synchronous>, transform_indices = @transform_10, window_bounds = array<i64: 1, 32>}, {pipeline_mode = #tpu.pipeline_mode<synchronous>, transform_indices = @transform_11, window_bounds = array<i64: 32, 256>}, {pipeline_mode = #tpu.pipeline_mode<synchronous>, transform_indices = @transform_12, window_bounds = array<i64: 1, 256>}, {pipeline_mode = #tpu.pipeline_mode<synchronous>, transform_indices = @transform_13, window_bounds = array<i64: 256, 256>}, {pipeline_mode = #tpu.pipeline_mode<synchronous>, transform_indices = @transform_14, window_bounds = array<i64: 1, 256>}, {pipeline_mode = #tpu.pipeline_mode<synchronous>, transform_indices = @transform_15, window_bounds = array<i64: 256, 16>}, {pipeline_mode = #tpu.pipeline_mode<synchronous>, transform_indices = @transform_16, window_bounds = array<i64: 1, 16>}, {pipeline_mode = #tpu.pipeline_mode<synchronous>, transform_indices = @transform_17, window_bounds = array<i64: 3, 16>}]} {
    %c0 = arith.constant 0 : index
    %c0_0 = arith.constant 0 : index
    %0 = vector.load %arg1[%c0, %c0_0] : memref<96x32xf32, #tpu.memory_space<vmem>>, vector<96x32xf32>
    %1 = vector.extract_strided_slice %0 {offsets = [0, 0], sizes = [92, 32], strides = [1, 1]} : vector<96x32xf32> to vector<92x32xf32>
    %2 = vector.extract_strided_slice %0 {offsets = [1, 0], sizes = [92, 32], strides = [1, 1]} : vector<96x32xf32> to vector<92x32xf32>
    %3 = vector.extract_strided_slice %0 {offsets = [2, 0], sizes = [92, 32], strides = [1, 1]} : vector<96x32xf32> to vector<92x32xf32>
    %4 = vector.extract_strided_slice %0 {offsets = [3, 0], sizes = [92, 32], strides = [1, 1]} : vector<96x32xf32> to vector<92x32xf32>
    %5 = vector.extract_strided_slice %0 {offsets = [4, 0], sizes = [92, 32], strides = [1, 1]} : vector<96x32xf32> to vector<92x32xf32>
    %6 = tpu.concatenate %1, %2, %3, %4, %5 in 1 : vector<92x32xf32>, vector<92x32xf32>, vector<92x32xf32>, vector<92x32xf32>, vector<92x32xf32> -> vector<92x160xf32>
    %7 = arith.truncf %6 : vector<92x160xf32> to vector<92x160xbf16>
    %c0_1 = arith.constant 0 : index
    %c0_2 = arith.constant 0 : index
    %8 = vector.load %arg2[%c0_1, %c0_2] : memref<160x32xbf16, #tpu.memory_space<vmem>>, vector<160x32xbf16>
    %cst = arith.constant dense<0.000000e+00> : vector<92x32xf32>
    %9 = tpu.matmul %7, %8, %cst {dimension_numbers = #tpu.dot_dimension_numbers<[1], [0], [0], [1], [0, 0, 1, 1], [], []>} : vector<92x160xbf16>, vector<160x32xbf16>, vector<92x32xf32> -> vector<92x32xf32>
    %c0_3 = arith.constant 0 : index
    %c0_4 = arith.constant 0 : index
    %10 = vector.load %arg3[%c0_3, %c0_4] : memref<1x32xf32, #tpu.memory_space<vmem>>, vector<1x32xf32>
    %11 = vector.broadcast %10 : vector<1x32xf32> to vector<92x32xf32>
    %12 = arith.addf %9, %11 : vector<92x32xf32>
    %cst_5 = arith.constant 0.000000e+00 : f32
    %13 = vector.broadcast %cst_5 : f32 to vector<92x32xf32>
    %14 = arith.maximumf %12, %13 : vector<92x32xf32>
    %15 = vector.extract_strided_slice %14 {offsets = [0, 0], sizes = [88, 32], strides = [1, 1]} : vector<92x32xf32> to vector<88x32xf32>
    %16 = vector.extract_strided_slice %14 {offsets = [4, 0], sizes = [88, 32], strides = [1, 1]} : vector<92x32xf32> to vector<88x32xf32>
    %17 = tpu.concatenate %15, %16 in 1 : vector<88x32xf32>, vector<88x32xf32> -> vector<88x64xf32>
    %18 = arith.truncf %17 : vector<88x64xf32> to vector<88x64xbf16>
    %c0_6 = arith.constant 0 : index
    %c0_7 = arith.constant 0 : index
    %19 = vector.load %arg4[%c0_6, %c0_7] : memref<64x32xbf16, #tpu.memory_space<vmem>>, vector<64x32xbf16>
    %cst_8 = arith.constant dense<0.000000e+00> : vector<88x32xf32>
    %20 = tpu.matmul %18, %19, %cst_8 {dimension_numbers = #tpu.dot_dimension_numbers<[1], [0], [0], [1], [0, 0, 1, 1], [], []>} : vector<88x64xbf16>, vector<64x32xbf16>, vector<88x32xf32> -> vector<88x32xf32>
    %c0_9 = arith.constant 0 : index
    %c0_10 = arith.constant 0 : index
    %21 = vector.load %arg5[%c0_9, %c0_10] : memref<1x32xf32, #tpu.memory_space<vmem>>, vector<1x32xf32>
    %22 = vector.broadcast %21 : vector<1x32xf32> to vector<88x32xf32>
    %23 = arith.addf %20, %22 : vector<88x32xf32>
    %cst_11 = arith.constant 0.000000e+00 : f32
    %24 = vector.broadcast %cst_11 : f32 to vector<88x32xf32>
    %25 = arith.maximumf %23, %24 : vector<88x32xf32>
    %26 = vector.extract_strided_slice %25 {offsets = [0, 0], sizes = [82, 32], strides = [1, 1]} : vector<88x32xf32> to vector<82x32xf32>
    %27 = vector.extract_strided_slice %25 {offsets = [6, 0], sizes = [82, 32], strides = [1, 1]} : vector<88x32xf32> to vector<82x32xf32>
    %28 = tpu.concatenate %26, %27 in 1 : vector<82x32xf32>, vector<82x32xf32> -> vector<82x64xf32>
    %29 = arith.truncf %28 : vector<82x64xf32> to vector<82x64xbf16>
    %c0_12 = arith.constant 0 : index
    %c0_13 = arith.constant 0 : index
    %30 = vector.load %arg6[%c0_12, %c0_13] : memref<64x32xbf16, #tpu.memory_space<vmem>>, vector<64x32xbf16>
    %cst_14 = arith.constant dense<0.000000e+00> : vector<82x32xf32>
    %31 = tpu.matmul %29, %30, %cst_14 {dimension_numbers = #tpu.dot_dimension_numbers<[1], [0], [0], [1], [0, 0, 1, 1], [], []>} : vector<82x64xbf16>, vector<64x32xbf16>, vector<82x32xf32> -> vector<82x32xf32>
    %c0_15 = arith.constant 0 : index
    %c0_16 = arith.constant 0 : index
    %32 = vector.load %arg7[%c0_15, %c0_16] : memref<1x32xf32, #tpu.memory_space<vmem>>, vector<1x32xf32>
    %33 = vector.broadcast %32 : vector<1x32xf32> to vector<82x32xf32>
    %34 = arith.addf %31, %33 : vector<82x32xf32>
    %cst_17 = arith.constant 0.000000e+00 : f32
    %35 = vector.broadcast %cst_17 : f32 to vector<82x32xf32>
    %36 = arith.maximumf %34, %35 : vector<82x32xf32>
    %37 = arith.truncf %36 : vector<82x32xf32> to vector<82x32xbf16>
    %c0_18 = arith.constant 0 : index
    %c0_19 = arith.constant 0 : index
    %38 = vector.load %arg8[%c0_18, %c0_19] : memref<32x32xbf16, #tpu.memory_space<vmem>>, vector<32x32xbf16>
    %cst_20 = arith.constant dense<0.000000e+00> : vector<82x32xf32>
    %39 = tpu.matmul %37, %38, %cst_20 {dimension_numbers = #tpu.dot_dimension_numbers<[1], [0], [0], [1], [0, 0, 1, 1], [], []>} : vector<82x32xbf16>, vector<32x32xbf16>, vector<82x32xf32> -> vector<82x32xf32>
    %c0_21 = arith.constant 0 : index
    %c0_22 = arith.constant 0 : index
    %40 = vector.load %arg9[%c0_21, %c0_22] : memref<1x32xf32, #tpu.memory_space<vmem>>, vector<1x32xf32>
    %41 = vector.broadcast %40 : vector<1x32xf32> to vector<82x32xf32>
    %42 = arith.addf %39, %41 : vector<82x32xf32>
    %cst_23 = arith.constant 0.000000e+00 : f32
    %43 = vector.broadcast %cst_23 : f32 to vector<82x32xf32>
    %44 = arith.maximumf %42, %43 : vector<82x32xf32>
    %45 = arith.truncf %44 : vector<82x32xf32> to vector<82x32xbf16>
    %c0_24 = arith.constant 0 : index
    %c0_25 = arith.constant 0 : index
    %46 = vector.load %arg10[%c0_24, %c0_25] : memref<32x32xbf16, #tpu.memory_space<vmem>>, vector<32x32xbf16>
    %cst_26 = arith.constant dense<0.000000e+00> : vector<82x32xf32>
    %47 = tpu.matmul %45, %46, %cst_26 {dimension_numbers = #tpu.dot_dimension_numbers<[1], [0], [0], [1], [0, 0, 1, 1], [], []>} : vector<82x32xbf16>, vector<32x32xbf16>, vector<82x32xf32> -> vector<82x32xf32>
    %c0_27 = arith.constant 0 : index
    %c0_28 = arith.constant 0 : index
    %48 = vector.load %arg11[%c0_27, %c0_28] : memref<1x32xf32, #tpu.memory_space<vmem>>, vector<1x32xf32>
    %49 = vector.broadcast %48 : vector<1x32xf32> to vector<82x32xf32>
    %50 = arith.addf %47, %49 : vector<82x32xf32>
    %51 = vector.extract_strided_slice %50 {offsets = [0, 0], sizes = [10, 32], strides = [1, 1]} : vector<82x32xf32> to vector<10x32xf32>
    %cst_29 = arith.constant dense<0.000000e+00> : vector<32xf32>
    %52 = vector.multi_reduction <add>, %51, %cst_29 [0] : vector<10x32xf32> to vector<32xf32>
    %53 = vector.shape_cast %52 : vector<32xf32> to vector<1x32xf32>
    %cst_30 = arith.constant 1.000000e+01 : f32
    %54 = vector.broadcast %cst_30 : f32 to vector<1x32xf32>
    %55 = arith.divf %53, %54 : vector<1x32xf32>
    %56 = vector.extract_strided_slice %50 {offsets = [32, 0], sizes = [16, 32], strides = [1, 1]} : vector<82x32xf32> to vector<16x32xf32>
    %cst_31 = arith.constant dense<0.000000e+00> : vector<32xf32>
    %57 = vector.multi_reduction <add>, %56, %cst_31 [0] : vector<16x32xf32> to vector<32xf32>
    %58 = vector.shape_cast %57 : vector<32xf32> to vector<1x32xf32>
    %cst_32 = arith.constant 1.600000e+01 : f32
    %59 = vector.broadcast %cst_32 : f32 to vector<1x32xf32>
    %60 = arith.divf %58, %59 : vector<1x32xf32>
    %61 = vector.extract_strided_slice %50 {offsets = [64, 0], sizes = [6, 32], strides = [1, 1]} : vector<82x32xf32> to vector<6x32xf32>
    %cst_33 = arith.constant dense<0.000000e+00> : vector<32xf32>
    %62 = vector.multi_reduction <add>, %61, %cst_33 [0] : vector<6x32xf32> to vector<32xf32>
    %63 = vector.shape_cast %62 : vector<32xf32> to vector<1x32xf32>
    %cst_34 = arith.constant 6.000000e+00 : f32
    %64 = vector.broadcast %cst_34 : f32 to vector<1x32xf32>
    %65 = arith.divf %63, %64 : vector<1x32xf32>
    %66 = tpu.concatenate %55, %60, %65 in 0 : vector<1x32xf32>, vector<1x32xf32>, vector<1x32xf32> -> vector<3x32xf32>
    %67 = arith.truncf %66 : vector<3x32xf32> to vector<3x32xbf16>
    %c0_35 = arith.constant 0 : index
    %c0_36 = arith.constant 0 : index
    %68 = vector.load %arg12[%c0_35, %c0_36] : memref<32x256xbf16, #tpu.memory_space<vmem>>, vector<32x256xbf16>
    %cst_37 = arith.constant dense<0.000000e+00> : vector<3x256xf32>
    %69 = tpu.matmul %67, %68, %cst_37 {dimension_numbers = #tpu.dot_dimension_numbers<[1], [0], [0], [1], [0, 0, 1, 1], [], []>} : vector<3x32xbf16>, vector<32x256xbf16>, vector<3x256xf32> -> vector<3x256xf32>
    %c0_38 = arith.constant 0 : index
    %c0_39 = arith.constant 0 : index
    %70 = vector.load %arg13[%c0_38, %c0_39] : memref<1x256xf32, #tpu.memory_space<vmem>>, vector<1x256xf32>
    %71 = vector.broadcast %70 : vector<1x256xf32> to vector<3x256xf32>
    %72 = arith.addf %69, %71 : vector<3x256xf32>
    %cst_40 = arith.constant 0.000000e+00 : f32
    %73 = vector.broadcast %cst_40 : f32 to vector<3x256xf32>
    %74 = arith.maximumf %72, %73 : vector<3x256xf32>
    %75 = arith.truncf %74 : vector<3x256xf32> to vector<3x256xbf16>
    %c0_41 = arith.constant 0 : index
    %c0_42 = arith.constant 0 : index
    %76 = vector.load %arg14[%c0_41, %c0_42] : memref<256x256xbf16, #tpu.memory_space<vmem>>, vector<256x256xbf16>
    %cst_43 = arith.constant dense<0.000000e+00> : vector<3x256xf32>
    %77 = tpu.matmul %75, %76, %cst_43 {dimension_numbers = #tpu.dot_dimension_numbers<[1], [0], [0], [1], [0, 0, 1, 1], [], []>} : vector<3x256xbf16>, vector<256x256xbf16>, vector<3x256xf32> -> vector<3x256xf32>
    %c0_44 = arith.constant 0 : index
    %c0_45 = arith.constant 0 : index
    %78 = vector.load %arg15[%c0_44, %c0_45] : memref<1x256xf32, #tpu.memory_space<vmem>>, vector<1x256xf32>
    %79 = vector.broadcast %78 : vector<1x256xf32> to vector<3x256xf32>
    %80 = arith.addf %77, %79 : vector<3x256xf32>
    %cst_46 = arith.constant 0.000000e+00 : f32
    %81 = vector.broadcast %cst_46 : f32 to vector<3x256xf32>
    %82 = arith.maximumf %80, %81 : vector<3x256xf32>
    %83 = arith.truncf %82 : vector<3x256xf32> to vector<3x256xbf16>
    %c0_47 = arith.constant 0 : index
    %c0_48 = arith.constant 0 : index
    %84 = vector.load %arg16[%c0_47, %c0_48] : memref<256x16xbf16, #tpu.memory_space<vmem>>, vector<256x16xbf16>
    %cst_49 = arith.constant dense<0.000000e+00> : vector<3x16xf32>
    %85 = tpu.matmul %83, %84, %cst_49 {dimension_numbers = #tpu.dot_dimension_numbers<[1], [0], [0], [1], [0, 0, 1, 1], [], []>} : vector<3x256xbf16>, vector<256x16xbf16>, vector<3x16xf32> -> vector<3x16xf32>
    %c0_50 = arith.constant 0 : index
    %c0_51 = arith.constant 0 : index
    %86 = vector.load %arg17[%c0_50, %c0_51] : memref<1x16xf32, #tpu.memory_space<vmem>>, vector<1x16xf32>
    %87 = vector.broadcast %86 : vector<1x16xf32> to vector<3x16xf32>
    %88 = arith.addf %85, %87 : vector<3x16xf32>
    %c0_52 = arith.constant 0 : index
    %c0_53 = arith.constant 0 : index
    %89 = vector.load %arg18[%c0_52, %c0_53] : memref<3x16xf32, #tpu.memory_space<vmem>>, vector<3x16xf32>
    tpu.vector_store %arg18[%c0_52, %c0_53], %88 {strides = array<i32>} : memref<3x16xf32, #tpu.memory_space<vmem>>, vector<3x16xf32>,
    return
  }
  func.func @transform_0(%arg0: i32) -> (i32, i32) {
    %c0_i32 = arith.constant 0 : i32
    %c0_i32_0 = arith.constant 0 : i32
    %c0_i32_1 = arith.constant 0 : i32
    return %c0_i32, %c0_i32_0 : i32, i32
  }
  func.func @transform_1(%arg0: i32) -> (i32, i32) {
    %c0_i32 = arith.constant 0 : i32
    %c0_i32_0 = arith.constant 0 : i32
    %c0_i32_1 = arith.constant 0 : i32
    return %c0_i32, %c0_i32_0 : i32, i32
  }
  func.func @transform_2(%arg0: i32) -> (i32, i32) {
    %c0_i32 = arith.constant 0 : i32
    %c0_i32_0 = arith.constant 0 : i32
    %c0_i32_1 = arith.constant 0 : i32
    return %c0_i32, %c0_i32_0 : i32, i32
  }
  func.func @transform_3(%arg0: i32) -> (i32, i32) {
    %c0_i32 = arith.constant 0 : i32
    %c0_i32_0 = arith.constant 0 : i32
    %c0_i32_1 = arith.constant 0 : i32
    return %c0_i32, %c0_i32_0 : i32, i32
  }
  func.func @transform_4(%arg0: i32) -> (i32, i32) {
    %c0_i32 = arith.constant 0 : i32
    %c0_i32_0 = arith.constant 0 : i32
    %c0_i32_1 = arith.constant 0 : i32
    return %c0_i32, %c0_i32_0 : i32, i32
  }
  func.func @transform_5(%arg0: i32) -> (i32, i32) {
    %c0_i32 = arith.constant 0 : i32
    %c0_i32_0 = arith.constant 0 : i32
    %c0_i32_1 = arith.constant 0 : i32
    return %c0_i32, %c0_i32_0 : i32, i32
  }
  func.func @transform_6(%arg0: i32) -> (i32, i32) {
    %c0_i32 = arith.constant 0 : i32
    %c0_i32_0 = arith.constant 0 : i32
    %c0_i32_1 = arith.constant 0 : i32
    return %c0_i32, %c0_i32_0 : i32, i32
  }
  func.func @transform_7(%arg0: i32) -> (i32, i32) {
    %c0_i32 = arith.constant 0 : i32
    %c0_i32_0 = arith.constant 0 : i32
    %c0_i32_1 = arith.constant 0 : i32
    return %c0_i32, %c0_i32_0 : i32, i32
  }
  func.func @transform_8(%arg0: i32) -> (i32, i32) {
    %c0_i32 = arith.constant 0 : i32
    %c0_i32_0 = arith.constant 0 : i32
    %c0_i32_1 = arith.constant 0 : i32
    return %c0_i32, %c0_i32_0 : i32, i32
  }
  func.func @transform_9(%arg0: i32) -> (i32, i32) {
    %c0_i32 = arith.constant 0 : i32
    %c0_i32_0 = arith.constant 0 : i32
    %c0_i32_1 = arith.constant 0 : i32
    return %c0_i32, %c0_i32_0 : i32, i32
  }
  func.func @transform_10(%arg0: i32) -> (i32, i32) {
    %c0_i32 = arith.constant 0 : i32
    %c0_i32_0 = arith.constant 0 : i32
    %c0_i32_1 = arith.constant 0 : i32
    return %c0_i32, %c0_i32_0 : i32, i32
  }
  func.func @transform_11(%arg0: i32) -> (i32, i32) {
    %c0_i32 = arith.constant 0 : i32
    %c0_i32_0 = arith.constant 0 : i32
    %c0_i32_1 = arith.constant 0 : i32
    return %c0_i32, %c0_i32_0 : i32, i32
  }
  func.func @transform_12(%arg0: i32) -> (i32, i32) {
    %c0_i32 = arith.constant 0 : i32
    %c0_i32_0 = arith.constant 0 : i32
    %c0_i32_1 = arith.constant 0 : i32
    return %c0_i32, %c0_i32_0 : i32, i32
  }
  func.func @transform_13(%arg0: i32) -> (i32, i32) {
    %c0_i32 = arith.constant 0 : i32
    %c0_i32_0 = arith.constant 0 : i32
    %c0_i32_1 = arith.constant 0 : i32
    return %c0_i32, %c0_i32_0 : i32, i32
  }
  func.func @transform_14(%arg0: i32) -> (i32, i32) {
    %c0_i32 = arith.constant 0 : i32
    %c0_i32_0 = arith.constant 0 : i32
    %c0_i32_1 = arith.constant 0 : i32
    return %c0_i32, %c0_i32_0 : i32, i32
  }
  func.func @transform_15(%arg0: i32) -> (i32, i32) {
    %c0_i32 = arith.constant 0 : i32
    %c0_i32_0 = arith.constant 0 : i32
    %c0_i32_1 = arith.constant 0 : i32
    return %c0_i32, %c0_i32_0 : i32, i32
  }
  func.func @transform_16(%arg0: i32) -> (i32, i32) {
    %c0_i32 = arith.constant 0 : i32
    %c0_i32_0 = arith.constant 0 : i32
    %c0_i32_1 = arith.constant 0 : i32
    return %c0_i32, %c0_i32_0 : i32, i32
  }
  func.func @transform_17(%arg0: i32) -> (i32, i32) {
    %c0_i32 = arith.constant 0 : i32
    %c0_i32_0 = arith.constant 0 : i32
    %c0_i32_1 = arith.constant 0 : i32
    return %c0_i32, %c0_i32_0 : i32, i32
  }
}

</mosaic_0001>

<bundles_post_ra>
// kernel: tpu_custom_call.1
= control target key start
LH: loop header
LB: loop body
LE: loop exit
PB: predicated region body
PF: predicated region fallthrough
CT: control target
= control target key end

     0   :  { %s3118_s0 = inlined_call_operand.vmem [shape: f32[96,32], index: 0, kind: input, shape index: {}]   ;;  %s3119_s1 = inlined_call_operand.vmem [shape: bf16[160,32], index: 1, kind: input, shape index: {}]   ;;  %s3120_s2 = inlined_call_operand.vmem [shape: f32[1,32], index: 2, kind: input, shape index: {}]   ;;  %s3121_s3 = inlined_call_operand.vmem [shape: bf16[64,32], index: 3, kind: input, shape index: {}]   ;;  %s3122_s4 = inlined_call_operand.vmem [shape: f32[1,32], index: 4, kind: input, shape index: {}]   ;;  %s3123_s5 = inlined_call_operand.vmem [shape: bf16[64,32], index: 5, kind: input, shape index: {}]   ;;  %s3124_s6 = inlined_call_operand.vmem [shape: f32[1,32], index: 6, kind: input, shape index: {}]   ;;  %s3125_s7 = inlined_call_operand.vmem [shape: bf16[32,32], index: 7, kind: input, shape index: {}]   ;;  %s3126_s8 = inlined_call_operand.vmem [shape: f32[1,32], index: 8, kind: input, shape index: {}]   ;;  %s3127_s9 = inlined_call_operand.vmem [shape: bf16[32,32], index: 9, kind: input, shape index: {}]   ;;  %s3128_s10 = inlined_call_operand.vmem [shape: f32[1,32], index: 10, kind: input, shape index: {}]   ;;  %s3129_s11 = inlined_call_operand.vmem [shape: bf16[32,256], index: 11, kind: input, shape index: {}]   ;;  %s3130_s12 = inlined_call_operand.vmem [shape: f32[1,256], index: 12, kind: input, shape index: {}]   ;;  %s3131_s13 = inlined_call_operand.vmem [shape: bf16[256,256], index: 13, kind: input, shape index: {}]   ;;  %s3132_s14 = inlined_call_operand.vmem [shape: f32[1,256], index: 14, kind: input, shape index: {}]   ;;  %s3133_s15 = inlined_call_operand.vmem [shape: bf16[256,16], index: 15, kind: input, shape index: {}]   ;;  %s3134_s16 = inlined_call_operand.vmem [shape: f32[1,16], index: 16, kind: input, shape index: {}]   ;;  %s3135_s17 = inlined_call_operand.hbm [shape: f32[3,16], index: 17, kind: output, shape index: {}]  }
   0x1   :  { %3138 = sst [smem:[#allocation5_spill]] %s3118_s0 }
   0x2   :  { %3139 = sst [smem:[#allocation6_spill]] %s3119_s1 }
   0x3   :  { %s3140_s26 = sld [smem:[#allocation5_spill]]  ;;  %vm82_vm0 = vcmask 1046528   ;;  %vm202_vm1 = vcmask 1044480   ;;  %vm142_vm2 = vcmask 1045504   ;;  %s2333_s24 = smov 32   ;;  %vm262_vm3 = vcmask 1043456  }
   0x4   :  { %s2334_s25 = smov 96   ;;  %s2335_s30 = smov 64   ;;  %vm298_vm4 = vcmask 261120  }
   0x5   :  { %s3141_s23 = sld [smem:[#allocation6_spill]] }
   0x9   :  { %v2431_v0 = vld [vmem:[%s3140_s26] sm:$0xff]  ;;  %v2436_v1 = vld [vmem:[%s3140_s26 + $0x8] sm:$0xff]  ;;  %v2441_v2 = vld [vmem:[%s3140_s26 + $0x10] sm:$0xff] }
   0xa   :  { %v83_v3 = vrot.slane %v2431_v0, 1  ;;  %v84_v4 = vrot.slane %v2436_v1, 1  ;;  %v86_v5 = vrot.slane %v2441_v2, 1  ;;  %v203_v6 = vrot.slane %v2431_v0, 3  ;;  %v2453_v10 = vld [vmem:[%s3140_s26 + $0x18] sm:$0xff]  ;;  %v2458_v11 = vld [vmem:[%s3140_s26 + $0x20] sm:$0xff] }
   0xb   :  { %v204_v7 = vrot.slane %v2436_v1, 3  ;;  %v206_v8 = vrot.slane %v2441_v2, 3  ;;  %v143_v9 = vrot.slane %v2431_v0, 2  ;;  %v144_v14 = vrot.slane %v2436_v1, 2  ;;  %v2470_v20 = vld [vmem:[%s3140_s26 + $0x28] sm:$0xff]  ;;  %v2478_v25 = vld [vmem:[%s3140_s26 + $0x30] sm:$0xff] }
   0xc   :  { %v85_v12 = vsel %vm82_vm0, %v83_v3, %v84_v4  ;;  %v87_v13 = vsel %vm82_vm0, %v84_v4, %v86_v5  ;;  %v146_v15 = vrot.slane %v2441_v2, 2  ;;  %v88_v19 = vrot.slane %v2453_v10, 1  ;;  %v2492_v34 = vld [vmem:[%s3140_s26 + $0x38] sm:$0xff]  ;;  %v2500_v39 = vld [vmem:[%s3140_s26 + $0x40] sm:$0xff]  ;;  %v2516_v51 = vld [vmem:[%s3140_s26 + $0x48] sm:$0xff] }
   0xd   :  { %v2077_v16 = vpack.i.bf16 %v87_v13, %v85_v12  ;;  %v205_v17 = vsel %vm202_vm1, %v203_v6, %v204_v7  ;;  %v207_v18 = vsel %vm202_vm1, %v204_v7, %v206_v8  ;;  %v145_v22 = vsel %vm142_vm2, %v143_v9, %v144_v14  ;;  %v2524_v55 = vld [vmem:[%s3140_s26 + $0x50] sm:$0xff]  ;;  %v2217_v7 = vld [vmem:[%s3141_s23] sm:$0xff]  }
   0xe   :  { %v2087_v21 = vpack.i.bf16 %v207_v18, %v205_v17  ;;  %v147_v23 = vsel %vm142_vm2, %v144_v14, %v146_v15  ;;  %v90_v24 = vrot.slane %v2458_v11, 1  ;;  %v89_v27 = vsel %vm82_vm0, %v86_v5, %v88_v19  ;;  %v2552_v18 = vld [vmem:[%s3140_s26 + $0x58] sm:$0xff] }
   0xf   :  { %2078 = vrot.lane.b32.xlu0 %v2077_v16, %s2333_s24  ;;  %v2082_v26 = vpack.i.bf16 %v147_v23, %v145_v22  ;;  %v148_v28 = vrot.slane %v2453_v10, 2  ;;  %v150_v29 = vrot.slane %v2458_v11, 2  ;;  %v208_v31 = vrot.slane %v2453_v10, 3  ;;  %v2218_v23 = vld [vmem:[%s3141_s23 + $0x8] sm:$0xff]  }
  0x10   :  { %2088 = vrot.lane.b32.xlu1 %v2087_v21, %s2334_s25  ;;  %v91_v30 = vsel %vm82_vm0, %v88_v19, %v90_v24  ;;  %v210_v32 = vrot.slane %v2458_v11, 3  ;;  %v92_v33 = vrot.slane %v2470_v20, 1  ;;  %v94_v38 = vrot.slane %v2478_v25, 1 }
  0x11   :  { %v2092_v35 = vpack.i.bf16 %v91_v30, %v89_v27  ;;  %v149_v36 = vsel %vm142_vm2, %v146_v15, %v148_v28  ;;  %v151_v37 = vsel %vm142_vm2, %v148_v28, %v150_v29  ;;  %v209_v41 = vsel %vm202_vm1, %v206_v8, %v208_v31 }
  0x12   :  { %v2097_v40 = vpack.i.bf16 %v151_v37, %v149_v36  ;;  %v211_v42 = vsel %vm202_vm1, %v208_v31, %v210_v32  ;;  %v93_v44 = vsel %vm82_vm0, %v90_v24, %v92_v33  ;;  %v152_v45 = vrot.slane %v2470_v20, 2 }
  0x13   :  { %2083 = vrot.lane.b32.xlu0 %v2082_v26, %s2335_s30  ;;  %v2102_v43 = vpack.i.bf16 %v211_v42, %v209_v41  ;;  %v154_v46 = vrot.slane %v2478_v25, 2  ;;  %v95_v47 = vsel %vm82_vm0, %v92_v33, %v94_v38  ;;  %v212_v48 = vrot.slane %v2470_v20, 3 }
  0x14   :  { %2093 = vrot.lane.b32.xlu1 %v2092_v35, %s2333_s24  ;;  %v214_v49 = vrot.slane %v2478_v25, 3  ;;  %v96_v50 = vrot.slane %v2492_v34, 1  ;;  %v153_v52 = vsel %vm142_vm2, %v150_v29, %v152_v45  ;;  %v98_v54 = vrot.slane %v2500_v39, 1 }
  0x15   :  { %v155_v53 = vsel %vm142_vm2, %v152_v45, %v154_v46  ;;  %v2107_v56 = vpack.i.bf16 %v95_v47, %v93_v44  ;;  %v213_v58 = vsel %vm202_vm1, %v210_v32, %v212_v48  ;;  %v156_v59 = vrot.slane %v2492_v34, 2 }
  0x16   :  { %v2112_v57 = vpack.i.bf16 %v155_v53, %v153_v52  ;;  %v215_v60 = vsel %vm202_vm1, %v212_v48, %v214_v49  ;;  %v97_v61 = vsel %vm82_vm0, %v94_v38, %v96_v50  ;;  %v99_v62 = vsel %vm82_vm0, %v96_v50, %v98_v54  ;;  %v2220_v48 = vld [vmem:[%s3141_s23 + $0x18] sm:$0xff]  }
  0x17   :  { %2098 = vrot.lane.b32.xlu0 %v2097_v40, %s2335_s30  ;;  %v158_v63 = vrot.slane %v2500_v39, 2  ;;  %v216_v3 = vrot.slane %v2492_v34, 3  ;;  %v218_v4 = vrot.slane %v2500_v39, 3  ;;  %v100_v5 = vrot.slane %v2516_v51, 1  ;;  %v2219_v40 = vld [vmem:[%s3141_s23 + $0x10] sm:$0xff]  }
  0x18   :  { %2103 = vrot.lane.b32.xlu1 %v2102_v43, %s2334_s25  ;;  %v102_v6 = vrot.slane %v2524_v55, 1  ;;  %v2117_v8 = vpack.i.bf16 %v215_v60, %v213_v58  ;;  %v157_v9 = vsel %vm142_vm2, %v154_v46, %v156_v59  ;;  %v2122_v12 = vpack.i.bf16 %v99_v62, %v97_v61  ;;  %v2222_v58 = vld [vmem:[%s3141_s23 + $0x28] sm:$0xff]   ;;  %v2224_v60 = vld [vmem:[%s3141_s23 + $0x38] sm:$0xff]   ;;  %v2225_v61 = vld [vmem:[%s3141_s23 + $0x40] sm:$0xff]  }
  0x19   :  { %v159_v13 = vsel %vm142_vm2, %v156_v59, %v158_v63  ;;  %v160_v14 = vrot.slane %v2516_v51, 2  ;;  %v162_v15 = vrot.slane %v2524_v55, 2  ;;  %v217_v16 = vsel %vm202_vm1, %v214_v49, %v216_v3  ;;  %v2223_v59 = vld [vmem:[%s3141_s23 + $0x30] sm:$0xff]  }
  0x1a   :  { %v219_v17 = vsel %vm202_vm1, %v216_v3, %v218_v4  ;;  %v220_v19 = vrot.slane %v2516_v51, 3  ;;  %v222_v21 = vrot.slane %v2524_v55, 3  ;;  %v2336_v22 = vmov 0  }
  0x1b   :  { %2108 = vrot.lane.b32.xlu0 %v2107_v56, %s2333_s24  ;;  %454 = vmatprep.subr.bf16.mxu0 %v2336_v22  ;;  %v2127_v24 = vpack.i.bf16 %v159_v13, %v157_v9  ;;  %v101_v26 = vsel %vm82_vm0, %v98_v54, %v100_v5  ;;  %v103_v27 = vsel %vm82_vm0, %v100_v5, %v102_v6  ;;  %v104_v31 = vrot.slane %v2552_v18, 1  ;;  %v2221_v54 = vld [vmem:[%s3141_s23 + $0x20] sm:$0xff]  }
  0x1c   :  { %2113 = vrot.lane.b32.xlu1 %v2112_v57, %s2335_s30  ;;  %v2132_v28 = vpack.i.bf16 %v219_v17, %v217_v16  ;;  %v161_v29 = vsel %vm142_vm2, %v158_v63, %v160_v14  ;;  %v163_v30 = vsel %vm142_vm2, %v160_v14, %v162_v15  ;;  %455 = vmatpush1.bf16.msra.mxu0 %v2217_v7  ;;  %v263_v32 = vrot.slane %v2431_v0, 4 }
  0x1d   :  { %456 = vmatprep.subr.bf16.mxu0 %v2336_v22  ;;  %v264_v33 = vrot.slane %v2436_v1, 4  ;;  %v266_v35 = vrot.slane %v2441_v2, 4  ;;  %v2137_v36 = vpack.i.bf16 %v103_v27, %v101_v26  ;;  %v2142_v37 = vpack.i.bf16 %v163_v30, %v161_v29 }
  0x1e   :  { %v164_v38 = vrot.slane %v2552_v18, 2  ;;  %v221_v43 = vsel %vm202_vm1, %v218_v4, %v220_v19  ;;  %v223_v44 = vsel %vm202_vm1, %v220_v19, %v222_v21  ;;  %v224_v45 = vrot.slane %v2552_v18, 3 }
  0x1f   :  { %2118 = vrot.lane.b32.xlu0 %v2117_v8, %s2334_s25  ;;  %v265_v41 = vsel %vm262_vm3, %v263_v32, %v264_v33  ;;  %v267_v42 = vsel %vm262_vm3, %v264_v33, %v266_v35  ;;  %v105_v47 = vsel %vm82_vm0, %v102_v6, %v104_v31  ;;  %v2147_v49 = vpack.i.bf16 %v223_v44, %v221_v43 }
  0x20   :  { %2123 = vrot.lane.b32.xlu1 %v2122_v12, %s2333_s24  ;;  %457 = vmatpush1.bf16.msra.mxu0 %v2218_v23  ;;  %v338_v46 = vpack.c.bf16 %v267_v42, %v265_v41  ;;  %v2152_v50 = vpack.i.bf16 %v104_v31, %v105_v47  ;;  %v165_v52 = vsel %vm142_vm2, %v162_v15, %v164_v38 }
  0x21   :  { %458 = vmatprep.subr.bf16.mxu0 %v2336_v22  ;;  %v225_v53 = vsel %vm202_vm1, %v222_v21, %v224_v45  ;;  %v2157_v56 = vpack.i.bf16 %v164_v38, %v165_v52 }
  0x22   :  { %1842 = vmatprep.mubr.msk.bf16.mxu0 %vm298_vm4, %v338_v46  ;;  %v2162_v57 = vpack.i.bf16 %v224_v45, %v225_v53 }
  0x23   :  { %2128 = vrot.lane.b32.xlu0 %v2127_v24, %s2335_s30 }
  0x24   :  { %2133 = vrot.lane.b32.xlu1 %v2132_v28, %s2334_s25  ;;  %459 = vmatpush1.bf16.msra.mxu0 %v2219_v40 }
  0x25   :  { %460 = vmatprep.subr.bf16.mxu0 %v2336_v22 }
  0x27   :  { %2138 = vrot.lane.b32.xlu0 %v2137_v36, %s2333_s24 }
  0x28   :  { %2143 = vrot.lane.b32.xlu1 %v2142_v37, %s2335_s30  ;;  %461 = vmatpush1.bf16.msra.mxu0 %v2220_v48 }
  0x29   :  { %462 = vmatprep.subr.bf16.mxu0 %v2336_v22 }
  0x2b   :  { %2148 = vrot.lane.b32.xlu0 %v2147_v49, %s2334_s25 }
  0x2c   :  { %2153 = vrot.lane.b32.xlu1 %v2152_v50, %s2333_s24  ;;  %463 = vmatpush1.bf16.msra.mxu0 %v2221_v54 }
  0x2d   :  { %464 = vmatprep.subr.bf16.mxu0 %v2336_v22 }
  0x2f   :  { %2158 = vrot.lane.b32.xlu0 %v2157_v56, %s2335_s30 }
  0x30   :  { %2163 = vrot.lane.b32.xlu1 %v2162_v57, %s2334_s25  ;;  %465 = vmatpush1.bf16.msra.mxu0 %v2222_v58 }
  0x31   :  { %466 = vmatprep.subr.bf16.mxu0 %v2336_v22 }
  0x34   :  { %467 = vmatpush1.bf16.msra.mxu0 %v2223_v59 }
  0x35   :  { %468 = vmatprep.subr.bf16.mxu0 %v2336_v22 }
  0x38   :  { %469 = vmatpush1.bf16.msra.mxu0 %v2224_v60 }
  0x39   :  { %22 = vsyncpa [#allocation3], 0  ;;  %470 = vmatprep.subr.bf16.mxu0 %v2336_v22  ;;  %v2226_v62 = vld [vmem:[%s3141_s23 + $0x48] sm:$0xff]   ;;  %v268_v3 = vrot.slane %v2453_v10, 4  ;;  %v270_v4 = vrot.slane %v2458_v11, 4  ;;  %vm311_vm5 = vcmask 523264  }
  0x3a   :  { %vm324_vm6 = vcmask 785408   ;;  %v272_v29 = vrot.slane %v2470_v20, 4  ;;  %v274_v38 = vrot.slane %v2478_v25, 4  ;;  %v276_v60 = vrot.slane %v2492_v34, 4 }
  0x3b   :  { %v269_v13 = vsel %vm262_vm3, %v266_v35, %v268_v3  ;;  %v271_v14 = vsel %vm262_vm3, %v268_v3, %v270_v4  ;;  %vm791_vm7 = vcmask 1041408   ;;  %vm1271_vm8 = vcmask 254976  }
  0x3c   :  { %471 = vmatpush1.bf16.msra.mxu0 %v2225_v61  ;;  %v340_v28 = vpack.c.bf16 %v271_v14, %v269_v13  ;;  %v273_v46 = vsel %vm262_vm3, %v270_v4, %v272_v29  ;;  %v275_v47 = vsel %vm262_vm3, %v272_v29, %v274_v38  ;;  %v278_v61 = vrot.slane %v2500_v39, 4 }
  0x3d   :  { %472 = vmatprep.subr.bf16.mxu0 %v2336_v22  ;;  %v342_v57 = vpack.c.bf16 %v275_v47, %v273_v46  ;;  %vm1293_vm9 = vcmask 259072   ;;  %vm1303_vm10 = vcmask 1040384   ;;  %vm1815_vm11 = vcmask 124928  }
  0x40   :  { %473 = vmatpush1.bf16.msra.mxu0 %v2226_v62 }
  0x81   :  { %v2079_v63 = vpop.permute.xlu0 %2078 }
  0x82   :  { %v2089_v5 = vpop.permute.xlu1 %2088  ;;  %v2081_v6 = vunpack.i.h.bf16 %v2079_v63  ;;  %v2080_v7 = vunpack.i.l.bf16 %v2079_v63 }
  0x83   :  { %v2091_v8 = vunpack.i.h.bf16 %v2089_v5  ;;  %v2090_v9 = vunpack.i.l.bf16 %v2089_v5 }
  0x84   :  { %v300_v19 = vsel %vm298_vm4, %v2436_v1, %v2081_v6  ;;  %v299_v21 = vsel %vm298_vm4, %v2431_v0, %v2080_v7  ;;  %v279_v7 = vsel %vm262_vm3, %v276_v60, %v278_v61 }
  0x85   :  { %v2084_v12 = vpop.permute.xlu0 %2083 }
  0x86   :  { %v2086_v15 = vunpack.i.h.bf16 %v2084_v12  ;;  %v2085_v16 = vunpack.i.l.bf16 %v2084_v12  ;;  %v2094_v17 = vpop.permute.xlu1 %2093 }
  0x87   :  { %v2096_v23 = vunpack.i.h.bf16 %v2094_v17  ;;  %v2095_v24 = vunpack.i.l.bf16 %v2094_v17 }
  0x88   :  { %v312_v26 = vsel %vm311_vm5, %v299_v21, %v2085_v16  ;;  %v313_v27 = vsel %vm311_vm5, %v300_v19, %v2086_v15 }
  0x89   :  { %v302_v30 = vsel %vm298_vm4, %v2453_v10, %v2096_v23  ;;  %v301_v31 = vsel %vm298_vm4, %v2441_v2, %v2095_v24  ;;  %v2099_v32 = vpop.permute.xlu0 %2098  ;;  %v325_v1 = vsel %vm324_vm6, %v312_v26, %v2090_v9  ;;  %v326_v0 = vsel %vm324_vm6, %v313_v27, %v2091_v8 }
  0x8a   :  { %v2101_v33 = vunpack.i.h.bf16 %v2099_v32  ;;  %v2100_v35 = vunpack.i.l.bf16 %v2099_v32  ;;  %v2104_v36 = vpop.permute.xlu1 %2103  ;;  %v337_v37 = vpack.c.bf16 %v326_v0, %v325_v1  ;;  %v280_v23 = vrot.slane %v2516_v51, 4 }
  0x8b   :  { %v2106_v40 = vunpack.i.h.bf16 %v2104_v36  ;;  %v2105_v41 = vunpack.i.l.bf16 %v2104_v36  ;;  %v282_v24 = vrot.slane %v2524_v55, 4 }
  0x8c   :  { %v315_v42 = vsel %vm311_vm5, %v302_v30, %v2101_v33  ;;  %v314_v10 = vsel %vm311_vm5, %v301_v31, %v2100_v35  ;;  %487 = vmatmul.mubr.bf16.vlgmr.msra.gmra.mrb[0].mxu0 %v337_v37 }
  0x8d   :  { %v2109_v43 = vpop.permute.xlu0 %2108  ;;  %1843 = vmatprep.mubr.msk.bf16.mxu0 %vm298_vm4, %v340_v28  ;;  %v327_v48 = vsel %vm324_vm6, %v314_v10, %v2105_v41  ;;  %v328_v49 = vsel %vm324_vm6, %v315_v42, %v2106_v40  ;;  %v283_v32 = vsel %vm262_vm3, %v280_v23, %v282_v24  ;;  %v284_v10 = vrot.slane %v2552_v18, 4 }
  0x8e   :  { %v2111_v2 = vunpack.i.h.bf16 %v2109_v43  ;;  %v2110_v44 = vunpack.i.l.bf16 %v2109_v43  ;;  %v2114_v45 = vpop.permute.xlu1 %2113  ;;  %v339_v58 = vpack.c.bf16 %v328_v49, %v327_v48 }
  0x8f   :  { %v2116_v50 = vunpack.i.h.bf16 %v2114_v45  ;;  %v2115_v52 = vunpack.i.l.bf16 %v2114_v45 }
  0x90   :  { %v304_v53 = vsel %vm298_vm4, %v2470_v20, %v2111_v2  ;;  %v303_v54 = vsel %vm298_vm4, %v2458_v11, %v2110_v44  ;;  %v277_v11 = vsel %vm262_vm3, %v274_v38, %v276_v60 }
  0x91   :  { %v2119_v56 = vpop.permute.xlu0 %2118  ;;  %v316_v3 = vsel %vm311_vm5, %v303_v54, %v2115_v52  ;;  %v317_v4 = vsel %vm311_vm5, %v304_v53, %v2116_v50  ;;  %v344_v17 = vpack.c.bf16 %v279_v7, %v277_v11 }
  0x92   :  { %v2124_v59 = vpop.permute.xlu1 %2123  ;;  %v2121_v62 = vunpack.i.h.bf16 %v2119_v56  ;;  %v2120_v63 = vunpack.i.l.bf16 %v2119_v56 }
  0x93   :  { %v2126_v5 = vunpack.i.h.bf16 %v2124_v59  ;;  %v2125_v20 = vunpack.i.l.bf16 %v2124_v59 }
  0x94   :  { %495 = vmatmul.mubr.bf16.gmra.mrb[4].mxu0 %v339_v58  ;;  %v329_v8 = vsel %vm324_vm6, %v316_v3, %v2120_v63  ;;  %v330_v9 = vsel %vm324_vm6, %v317_v4, %v2121_v62 }
  0x95   :  { %v2129_v6 = vpop.permute.xlu0 %2128  ;;  %1844 = vmatprep.mubr.msk.bf16.mxu0 %vm298_vm4, %v342_v57  ;;  %v306_v15 = vsel %vm298_vm4, %v2492_v34, %v2126_v5  ;;  %v305_v16 = vsel %vm298_vm4, %v2478_v25, %v2125_v20  ;;  %v341_v19 = vpack.c.bf16 %v330_v9, %v329_v8  ;;  %v281_v25 = vsel %vm262_vm3, %v278_v61, %v280_v23  ;;  %v2702_v20 = vld [vmem:[%s3120_s2] ss:$0 sm:$0xff]  ;;  %v2228_v8 = vld [vmem:[%s3121_s3 + $0x8] sm:$0xff]  }
  0x96   :  { %v2131_v12 = vunpack.i.h.bf16 %v2129_v6  ;;  %v2130_v13 = vunpack.i.l.bf16 %v2129_v6  ;;  %v2134_v14 = vpop.permute.xlu1 %2133  ;;  %v346_v40 = vpack.c.bf16 %v283_v32, %v281_v25 }
  0x97   :  { %v2136_v26 = vunpack.i.h.bf16 %v2134_v14  ;;  %v2135_v27 = vunpack.i.l.bf16 %v2134_v14 }
  0x98   :  { %v319_v28 = vsel %vm311_vm5, %v306_v15, %v2131_v12  ;;  %v318_v29 = vsel %vm311_vm5, %v305_v16, %v2130_v13  ;;  %v2229_v12 = vld [vmem:[%s3121_s3 + $0x10] sm:$0xff]  }
  0x99   :  { %v2139_v21 = vpop.permute.xlu0 %2138  ;;  %v331_v1 = vsel %vm324_vm6, %v318_v29, %v2135_v27  ;;  %v332_v0 = vsel %vm324_vm6, %v319_v28, %v2136_v26  ;;  %v2230_v27 = vld [vmem:[%s3121_s3 + $0x18] sm:$0xff]  }
  0x9a   :  { %v2144_v30 = vpop.permute.xlu1 %2143  ;;  %v2141_v31 = vunpack.i.h.bf16 %v2139_v21  ;;  %v2140_v34 = vunpack.i.l.bf16 %v2139_v21  ;;  %v343_v41 = vpack.c.bf16 %v332_v0, %v331_v1 }
  0x9b   :  { %v2146_v33 = vunpack.i.h.bf16 %v2144_v30  ;;  %v2145_v35 = vunpack.i.l.bf16 %v2144_v30 }
  0x9c   :  { %503 = vmatmul.mubr.bf16.gmra.mrb[8].mxu0 %v341_v19  ;;  %v308_v37 = vsel %vm298_vm4, %v2516_v51, %v2141_v31  ;;  %v307_v38 = vsel %vm298_vm4, %v2500_v39, %v2140_v34  ;;  %v285_v51 = vsel %vm262_vm3, %v282_v24, %v284_v10 }
  0x9d   :  { %1845 = vmatprep.mubr.msk.bf16.mxu0 %vm298_vm4, %v344_v17  ;;  %v2149_v36 = vpop.permute.xlu0 %2148  ;;  %v320_v44 = vsel %vm311_vm5, %v307_v38, %v2145_v35  ;;  %v321_v45 = vsel %vm311_vm5, %v308_v37, %v2146_v33  ;;  %v348_v57 = vpack.c.bf16 %v284_v10, %v285_v51 }
  0x9e   :  { %v2154_v42 = vpop.permute.xlu1 %2153  ;;  %v2151_v43 = vunpack.i.h.bf16 %v2149_v36  ;;  %v2150_v2 = vunpack.i.l.bf16 %v2149_v36 }
  0x9f   :  { %v2156_v46 = vunpack.i.h.bf16 %v2154_v42  ;;  %v2155_v47 = vunpack.i.l.bf16 %v2154_v42 }
  0xa0   :  { %v333_v39 = vsel %vm324_vm6, %v320_v44, %v2150_v2  ;;  %v334_v49 = vsel %vm324_vm6, %v321_v45, %v2151_v43 }
  0xa1   :  { %v2159_v48 = vpop.permute.xlu0 %2158  ;;  %v310_v54 = vsel %vm298_vm4, %v2552_v18, %v2156_v46  ;;  %v309_v56 = vsel %vm298_vm4, %v2524_v55, %v2155_v47  ;;  %v345_v58 = vpack.c.bf16 %v334_v49, %v333_v39  ;;  %v2227_v55 = vld [vmem:[%s3121_s3] sm:$0xff]  }
  0xa2   :  { %v2161_v50 = vunpack.i.h.bf16 %v2159_v48  ;;  %v2160_v52 = vunpack.i.l.bf16 %v2159_v48  ;;  %v2164_v53 = vpop.permute.xlu1 %2163  ;;  %2000 = vmatprep.subr.bf16.mxu1 %v2227_v55 }
  0xa3   :  { %v2166_v59 = vunpack.i.h.bf16 %v2164_v53  ;;  %v2165_v60 = vunpack.i.l.bf16 %v2164_v53  ;;  %2001 = vmatpush3.bf16.msra.mxu1 %v2227_v55 }
  0xa4   :  { %511 = vmatmul.mubr.bf16.gmra.mrb[12].mxu0 %v343_v41  ;;  %v323_v61 = vsel %vm311_vm5, %v310_v54, %v2161_v50  ;;  %v322_v62 = vsel %vm311_vm5, %v309_v56, %v2160_v52  ;;  %2002 = vmatprep.subr.bf16.mxu1 %v2228_v8 }
  0xa5   :  { %1846 = vmatprep.mubr.msk.bf16.mxu0 %vm298_vm4, %v346_v40  ;;  %v335_v63 = vsel %vm324_vm6, %v322_v62, %v2165_v60  ;;  %v336_v3 = vsel %vm324_vm6, %v323_v61, %v2166_v59 }
  0xa6   :  { %v347_v4 = vpack.c.bf16 %v336_v3, %v335_v63 }
  0xa7   :  { %2003 = vmatpush3.bf16.msra.mxu1 %v2228_v8 }
  0xa8   :  { %2004 = vmatprep.subr.bf16.mxu1 %v2229_v12 }
  0xab   :  { %2005 = vmatpush3.bf16.msra.mxu1 %v2229_v12 }
  0xac   :  { %519 = vmatmul.mubr.bf16.gmra.mrb[16].mxu0 %v345_v58  ;;  %2006 = vmatprep.subr.bf16.mxu1 %v2230_v27 }
  0xad   :  { %1847 = vmatprep.mubr.msk.bf16.mxu0 %vm298_vm4, %v348_v57 }
  0xaf   :  { %2007 = vmatpush3.bf16.msra.mxu1 %v2230_v27 }
  0xb4   :  { %527 = vmatmul.mubr.bf16.gmra.mrb[20].mxu0 %v347_v4 }
 0x15f   :  { %v488_v18 = vpop.f32.mrb[0].mxu0 }
 0x160   :  { %v490_v5 = vpop.f32.mrb[1].mxu0  ;;  %v2711_v9 = vadd.f32 %v2702_v20, %v488_v18 }
 0x161   :  { %v491_v6 = vpop.f32.mrb[2].mxu0 }
 0x162   :  { %v2705_v11 = vadd.f32 %v2702_v20, %v491_v6  ;;  %v493_v7 = vpop.f32.mrb[3].mxu0  ;;  %v535_v15 = vmax.f32 %v2711_v9, 0.0 }
 0x164   :  { %v536_v13 = vmax.f32 %v2705_v11, 0.0  ;;  %v559_v28 = vrot.slane %v535_v15, 4 }
 0x166   :  { %v560_v21 = vrot.slane %v536_v13, 4 }
 0x167   :  { %v496_v14 = vpop.f32.mrb[4].mxu0 }
 0x168   :  { %v2719_v16 = vadd.f32 %v2702_v20, %v496_v14  ;;  %v498_v17 = vpop.f32.mrb[5].mxu0  ;;  %v561_v31 = vsel %vm262_vm3, %v559_v28, %v560_v21 }
 0x169   :  { %v499_v19 = vpop.f32.mrb[6].mxu0 }
 0x16a   :  { %v537_v23 = vmax.f32 %v2719_v16, 0.0  ;;  %v2725_v24 = vadd.f32 %v2702_v20, %v499_v19  ;;  %v501_v26 = vpop.f32.mrb[7].mxu0 }
 0x16c   :  { %v562_v29 = vrot.slane %v537_v23, 4  ;;  %v538_v30 = vmax.f32 %v2725_v24, 0.0 }
 0x16e   :  { %v563_v34 = vsel %vm262_vm3, %v560_v21, %v562_v29  ;;  %v564_v35 = vrot.slane %v538_v30, 4 }
 0x16f   :  { %v504_v25 = vpop.f32.mrb[8].mxu0  ;;  %v2167_v32 = vpack.i.bf16 %v563_v34, %v561_v31 }
 0x170   :  { %v2738_v1 = vadd.f32 %v2702_v20, %v504_v25  ;;  %v506_v0 = vpop.f32.mrb[9].mxu0  ;;  %v565_v42 = vsel %vm262_vm3, %v562_v29, %v564_v35 }
 0x171   :  { %v507_v33 = vpop.f32.mrb[10].mxu0  ;;  %2168 = vrot.lane.b32.xlu0 %v2167_v32, %s2333_s24 }
 0x172   :  { %v539_v36 = vmax.f32 %v2738_v1, 0.0  ;;  %v2745_v37 = vadd.f32 %v2702_v20, %v507_v33  ;;  %v509_v38 = vpop.f32.mrb[11].mxu0 }
 0x174   :  { %v566_v40 = vrot.slane %v539_v36, 4  ;;  %v540_v41 = vmax.f32 %v2745_v37, 0.0 }
 0x176   :  { %v567_v10 = vsel %vm262_vm3, %v564_v35, %v566_v40  ;;  %v568_v47 = vrot.slane %v540_v41, 4 }
 0x177   :  { %v512_v43 = vpop.f32.mrb[12].mxu0  ;;  %v2172_v2 = vpack.i.bf16 %v567_v10, %v565_v42 }
 0x178   :  { %v2753_v44 = vadd.f32 %v2702_v20, %v512_v43  ;;  %v514_v45 = vpop.f32.mrb[13].mxu0  ;;  %v569_v52 = vsel %vm262_vm3, %v566_v40, %v568_v47 }
 0x179   :  { %v515_v46 = vpop.f32.mrb[14].mxu0  ;;  %2173 = vrot.lane.b32.xlu1 %v2172_v2, %s2333_s24 }
 0x17a   :  { %v541_v48 = vmax.f32 %v2753_v44, 0.0  ;;  %v2760_v51 = vadd.f32 %v2702_v20, %v515_v46  ;;  %v517_v39 = vpop.f32.mrb[15].mxu0  ;;  %v2231_v44 = vld [vmem:[%s3123_s5] sm:$0xff]  }
 0x17b   :  { %2020 = vmatprep.subr.bf16.mxu1 %v2231_v44 }
 0x17c   :  { %v570_v49 = vrot.slane %v541_v48, 4  ;;  %v542_v50 = vmax.f32 %v2760_v51, 0.0 }
 0x17e   :  { %v571_v53 = vsel %vm262_vm3, %v568_v47, %v570_v49  ;;  %v572_v60 = vrot.slane %v542_v50, 4 }
 0x17f   :  { %v520_v54 = vpop.f32.mrb[16].mxu0  ;;  %v2177_v56 = vpack.i.bf16 %v571_v53, %v569_v52 }
 0x180   :  { %v2768_v57 = vadd.f32 %v2702_v20, %v520_v54  ;;  %v522_v58 = vpop.f32.mrb[17].mxu0  ;;  %v573_v55 = vsel %vm262_vm3, %v570_v49, %v572_v60 }
 0x181   :  { %v523_v59 = vpop.f32.mrb[18].mxu0  ;;  %2178 = vrot.lane.b32.xlu0 %v2177_v56, %s2333_s24 }
 0x182   :  { %v543_v61 = vmax.f32 %v2768_v57, 0.0  ;;  %v524_v62 = vadd.f32 %v2702_v20, %v523_v59  ;;  %v525_v63 = vpop.f32.mrb[19].mxu0 }
 0x184   :  { %v574_v3 = vrot.slane %v543_v61, 4  ;;  %v544_v4 = vmax.f32 %v524_v62, 0.0  ;;  %v2232_v62 = vld [vmem:[%s3123_s5 + $0x8] sm:$0xff]  }
 0x186   :  { %v575_v18 = vsel %vm262_vm3, %v572_v60, %v574_v3  ;;  %v576_v14 = vrot.slane %v544_v4, 4 }
 0x187   :  { %v528_v5 = vpop.f32.mrb[20].mxu0  ;;  %v2182_v6 = vpack.i.bf16 %v575_v18, %v573_v55  ;;  %v2233_v55 = vld [vmem:[%s3123_s5 + $0x10] sm:$0xff]  }
 0x188   :  { %v529_v7 = vadd.f32 %v2702_v20, %v528_v5  ;;  %v530_v8 = vpop.f32.mrb[21].mxu0  ;;  %v577_v29 = vsel %vm262_vm3, %v574_v3, %v576_v14  ;;  %v2234_v5 = vld [vmem:[%s3123_s5 + $0x18] sm:$0xff]  }
 0x189   :  { %v531_v12 = vpop.f32.mrb[22].mxu0  ;;  %2183 = vrot.lane.b32.xlu1 %v2182_v6, %s2333_s24 }
 0x18a   :  { %v545_v17 = vmax.f32 %v529_v7, 0.0  ;;  %v532_v19 = vadd.f32 %v2702_v20, %v531_v12  ;;  %v533_v21 = vpop.f32.mrb[23].mxu0 }
 0x18c   :  { %v578_v26 = vrot.slane %v545_v17, 4  ;;  %v546_v27 = vmax.f32 %v532_v19, 0.0 }
 0x18e   :  { %v580_v28 = vrot.slane %v546_v27, 4  ;;  %v579_v31 = vsel %vm262_vm3, %v576_v14, %v578_v26 }
 0x18f   :  { %v2187_v34 = vpack.i.bf16 %v579_v31, %v577_v29 }
 0x190   :  { %v581_v25 = vsel %vm262_vm3, %v578_v26, %v580_v28 }
 0x191   :  { %602 = vrot.lane.b32.xlu1 %v581_v25, %s2333_s24  ;;  %2188 = vrot.lane.b32.xlu0 %v2187_v34, %s2333_s24 }
 0x1e3   :  { %v2169_v32 = vpop.permute.xlu0 %2168 }
 0x1e4   :  { %v2171_v0 = vunpack.i.h.bf16 %v2169_v32  ;;  %v2170_v33 = vunpack.i.l.bf16 %v2169_v32 }
 0x1e6   :  { %v615_v20 = vsel %vm298_vm4, %v535_v15, %v2170_v33  ;;  %v616_v35 = vsel %vm298_vm4, %v536_v13, %v2171_v0 }
 0x1e7   :  { %v626_v38 = vpack.c.bf16 %v616_v35, %v615_v20 }
 0x1e9   :  { %2008 = vmatprep.mubr.msk.bf16.mxu1 %vm311_vm5, %v626_v38 }
 0x1eb   :  { %v2174_v40 = vpop.permute.xlu1 %2173 }
 0x1ec   :  { %v2176_v42 = vunpack.i.h.bf16 %v2174_v40  ;;  %v2175_v10 = vunpack.i.l.bf16 %v2174_v40 }
 0x1ee   :  { %v618_v43 = vsel %vm298_vm4, %v538_v30, %v2176_v42  ;;  %v617_v9 = vsel %vm298_vm4, %v537_v23, %v2175_v10 }
 0x1ef   :  { %v627_v2 = vpack.c.bf16 %v618_v43, %v617_v9 }
 0x1f1   :  { %2009 = vmatmul.mubr.msk.bf16.vlgmr.msra.gmra.mrb[0].mxu1 %vm311_vm5, %v627_v2 }
 0x1f2   :  { %2021 = vmatpush3.bf16.msra.mxu1 %v2231_v44 }
 0x1f3   :  { %v2179_v11 = vpop.permute.xlu0 %2178  ;;  %2022 = vmatprep.subr.bf16.mxu1 %v2232_v62 }
 0x1f4   :  { %v2181_v15 = vunpack.i.h.bf16 %v2179_v11  ;;  %v2180_v13 = vunpack.i.l.bf16 %v2179_v11 }
 0x1f6   :  { %v620_v45 = vsel %vm298_vm4, %v540_v41, %v2181_v15  ;;  %v619_v24 = vsel %vm298_vm4, %v539_v36, %v2180_v13  ;;  %2023 = vmatpush3.bf16.msra.mxu1 %v2232_v62 }
 0x1f7   :  { %v628_v46 = vpack.c.bf16 %v620_v45, %v619_v24  ;;  %2024 = vmatprep.subr.bf16.mxu1 %v2233_v55 }
 0x1f9   :  { %2012 = vmatprep.mubr.msk.bf16.mxu1 %vm311_vm5, %v628_v46 }
 0x1fa   :  { %2025 = vmatpush3.bf16.msra.mxu1 %v2233_v55 }
 0x1fb   :  { %v2184_v16 = vpop.permute.xlu1 %2183  ;;  %2026 = vmatprep.subr.bf16.mxu1 %v2234_v5 }
 0x1fc   :  { %v2186_v30 = vunpack.i.h.bf16 %v2184_v16  ;;  %v2185_v23 = vunpack.i.l.bf16 %v2184_v16 }
 0x1fe   :  { %v622_v47 = vsel %vm298_vm4, %v542_v50, %v2186_v30  ;;  %v621_v51 = vsel %vm298_vm4, %v541_v48, %v2185_v23  ;;  %v1848_v48 = vld [vmem:[%s3122_s4] ss:$0 sm:$0xff]  ;;  %2027 = vmatpush3.bf16.msra.mxu1 %v2234_v5 }
 0x1ff   :  { %v629_v39 = vpack.c.bf16 %v622_v47, %v621_v51 }
 0x201   :  { %2013 = vmatmul.mubr.msk.bf16.gmra.mrb[4].mxu1 %vm311_vm5, %v629_v39 }
 0x203   :  { %v603_v37 = vpop.permute.xlu1 %602  ;;  %v2189_v41 = vpop.permute.xlu0 %2188 }
 0x204   :  { %v2191_v1 = vunpack.i.h.bf16 %v2189_v41  ;;  %v2190_v49 = vunpack.i.l.bf16 %v2189_v41  ;;  %v625_v36 = vsel %vm298_vm4, %v545_v17, %v603_v37 }
 0x205   :  { %v631_v56 = vpack.c.bf16 %v625_v36, %v625_v36 }
 0x206   :  { %v624_v52 = vsel %vm298_vm4, %v544_v4, %v2191_v1  ;;  %v623_v53 = vsel %vm298_vm4, %v543_v61, %v2190_v49 }
 0x207   :  { %v630_v54 = vpack.c.bf16 %v624_v52, %v623_v53 }
 0x209   :  { %2016 = vmatprep.mubr.msk.bf16.mxu1 %vm311_vm5, %v630_v54 }
 0x20a   :  { %2017 = vmatmul.mubr.msk.bf16.gmra.mrb[8].mxu1 %vm311_vm5, %v631_v56 }
 0x2c4   :  { %v2010_v50 = vpop.f32.mrb[0].mxu1 }
 0x2c5   :  { %v2820_v57 = vadd.f32 %v2010_v50, %v1848_v48  ;;  %v723_v58 = vpop.f32.mrb[1].mxu1 }
 0x2c6   :  { %v2822_v59 = vadd.f32 %v1848_v48, %v723_v58  ;;  %v2011_v60 = vpop.f32.mrb[2].mxu1 }
 0x2c7   :  { %v726_v61 = vpop.f32.mrb[3].mxu1  ;;  %v771_v63 = vmax.f32 %v2820_v57, 0.0  ;;  %v2846_v19 = vadd.f32 %v2011_v60, %v1848_v48 }
 0x2c8   :  { %v769_v3 = vmax.f32 %v2822_v59, 0.0  ;;  %v2829_v4 = vadd.f32 %v1848_v48, %v726_v61  ;;  %v2236_v59 = vld [vmem:[%s3125_s7 + $0x8] sm:$0xff]  }
 0x2c9   :  { %v795_v6 = vrot.slane %v771_v63, 6  ;;  %v772_v21 = vmax.f32 %v2846_v19, 0.0 }
 0x2ca   :  { %v770_v18 = vmax.f32 %v2829_v4, 0.0  ;;  %v792_v7 = vrot.slane %v769_v3, 6 }
 0x2cb   :  { %v797_v25 = vrot.slane %v772_v21, 6 }
 0x2cc   :  { %v793_v8 = vrot.slane %v770_v18, 6 }
 0x2cd   :  { %v798_v10 = vsel %vm791_vm7, %v795_v6, %v797_v25 }
 0x2ce   :  { %v794_v12 = vsel %vm791_vm7, %v792_v7, %v793_v8  ;;  %v796_v14 = vsel %vm791_vm7, %v793_v8, %v795_v6 }
 0x2cf   :  { %v2192_v17 = vpack.i.bf16 %v796_v14, %v794_v12 }
 0x2d1   :  { %2193 = vrot.lane.b32.xlu0 %v2192_v17, %s2333_s24 }
 0x2d4   :  { %v2014_v26 = vpop.f32.mrb[4].mxu1 }
 0x2d5   :  { %v2850_v27 = vadd.f32 %v2014_v26, %v1848_v48  ;;  %v739_v28 = vpop.f32.mrb[5].mxu1 }
 0x2d6   :  { %v2852_v29 = vadd.f32 %v1848_v48, %v739_v28  ;;  %v2015_v31 = vpop.f32.mrb[6].mxu1 }
 0x2d7   :  { %v742_v34 = vpop.f32.mrb[7].mxu1  ;;  %v775_v32 = vmax.f32 %v2850_v27, 0.0  ;;  %v2856_v20 = vadd.f32 %v2015_v31, %v1848_v48  ;;  %v2237_v27 = vld [vmem:[%s3127_s9] sm:$0xff]  }
 0x2d8   :  { %v773_v0 = vmax.f32 %v2852_v29, 0.0  ;;  %v743_v33 = vadd.f32 %v1848_v48, %v742_v34 }
 0x2d9   :  { %v803_v40 = vrot.slane %v775_v32, 6  ;;  %v776_v9 = vmax.f32 %v2856_v20, 0.0 }
 0x2da   :  { %v799_v35 = vrot.slane %v773_v0, 6  ;;  %v774_v38 = vmax.f32 %v743_v33, 0.0 }
 0x2db   :  { %v805_v47 = vrot.slane %v776_v9, 6 }
 0x2dc   :  { %v801_v42 = vrot.slane %v774_v38, 6  ;;  %v800_v43 = vsel %vm791_vm7, %v797_v25, %v799_v35 }
 0x2dd   :  { %v2018_v2 = vpop.f32.mrb[8].mxu1  ;;  %v2197_v11 = vpack.i.bf16 %v800_v43, %v798_v10  ;;  %v806_v52 = vsel %vm791_vm7, %v803_v40, %v805_v47 }
 0x2de   :  { %v2863_v15 = vadd.f32 %v2018_v2, %v1848_v48  ;;  %v755_v13 = vpop.f32.mrb[9].mxu1  ;;  %v802_v45 = vsel %vm791_vm7, %v799_v35, %v801_v42  ;;  %v804_v24 = vsel %vm791_vm7, %v801_v42, %v803_v40 }
 0x2df   :  { %v756_v46 = vadd.f32 %v1848_v48, %v755_v13  ;;  %v2019_v16 = vpop.f32.mrb[10].mxu1  ;;  %2198 = vrot.lane.b32.xlu1 %v2197_v11, %s2333_s24  ;;  %v2202_v30 = vpack.i.bf16 %v804_v24, %v802_v45 }
 0x2e0   :  { %v758_v23 = vpop.f32.mrb[11].mxu1  ;;  %v779_v51 = vmax.f32 %v2863_v15, 0.0 }
 0x2e1   :  { %v777_v39 = vmax.f32 %v756_v46, 0.0  ;;  %v759_v37 = vadd.f32 %v1848_v48, %v758_v23  ;;  %2203 = vrot.lane.b32.xlu0 %v2202_v30, %s2333_s24  ;;  %v2235_v48 = vld [vmem:[%s3125_s7] sm:$0xff]  }
 0x2e2   :  { %v811_v49 = vrot.slane %v779_v51, 6  ;;  %2040 = vmatprep.subr.bf16.mxu1 %v2235_v48 }
 0x2e3   :  { %v807_v41 = vrot.slane %v777_v39, 6  ;;  %v778_v1 = vmax.f32 %v759_v37, 0.0  ;;  %v2238_v37 = vld [vmem:[%s3127_s9 + $0x8] sm:$0xff]  }
 0x2e5   :  { %v809_v36 = vrot.slane %v778_v1, 6  ;;  %v808_v53 = vsel %vm791_vm7, %v805_v47, %v807_v41 }
 0x2e6   :  { %v2207_v54 = vpack.i.bf16 %v808_v53, %v806_v52 }
 0x2e7   :  { %v810_v56 = vsel %vm791_vm7, %v807_v41, %v809_v36  ;;  %v812_v44 = vsel %vm791_vm7, %v809_v36, %v811_v49 }
 0x2e8   :  { %2208 = vrot.lane.b32.xlu1 %v2207_v54, %s2333_s24  ;;  %v2212_v50 = vpack.i.bf16 %v812_v44, %v810_v56 }
 0x2ea   :  { %2213 = vrot.lane.b32.xlu0 %v2212_v50, %s2333_s24 }
 0x2ec   :  { %833 = vrot.lane.b32.xlu1 %v811_v49, %s2333_s24 }
 0x343   :  { %v2194_v58 = vpop.permute.xlu0 %2193 }
 0x344   :  { %v2196_v60 = vunpack.i.h.bf16 %v2194_v58  ;;  %v2195_v61 = vunpack.i.l.bf16 %v2194_v58 }
 0x346   :  { %v847_v62 = vsel %vm298_vm4, %v770_v18, %v2196_v60  ;;  %v846_v55 = vsel %vm298_vm4, %v769_v3, %v2195_v61 }
 0x347   :  { %v857_v5 = vpack.c.bf16 %v847_v62, %v846_v55 }
 0x349   :  { %2028 = vmatprep.mubr.msk.bf16.mxu1 %vm311_vm5, %v857_v5 }
 0x351   :  { %v2199_v6 = vpop.permute.xlu1 %2198 }
 0x352   :  { %v2201_v7 = vunpack.i.h.bf16 %v2199_v6  ;;  %v2200_v8 = vunpack.i.l.bf16 %v2199_v6 }
 0x353   :  { %v2204_v12 = vpop.permute.xlu0 %2203 }
 0x354   :  { %v849_v14 = vsel %vm298_vm4, %v772_v21, %v2201_v7  ;;  %v848_v17 = vsel %vm298_vm4, %v771_v63, %v2200_v8  ;;  %v2206_v4 = vunpack.i.h.bf16 %v2204_v12  ;;  %v2205_v19 = vunpack.i.l.bf16 %v2204_v12 }
 0x355   :  { %v858_v18 = vpack.c.bf16 %v849_v14, %v848_v17 }
 0x356   :  { %v851_v3 = vsel %vm298_vm4, %v774_v38, %v2206_v4  ;;  %v850_v26 = vsel %vm298_vm4, %v773_v0, %v2205_v19 }
 0x357   :  { %v859_v28 = vpack.c.bf16 %v851_v3, %v850_v26  ;;  %2029 = vmatmul.mubr.msk.bf16.vlgmr.msra.gmra.mrb[12].mxu1 %vm311_vm5, %v858_v18  ;;  %v1870_v18 = vld [vmem:[%s3126_s8] ss:$0 sm:$0xff] }
 0x358   :  { %2041 = vmatpush3.bf16.msra.mxu1 %v2235_v48 }
 0x359   :  { %2032 = vmatprep.mubr.msk.bf16.mxu1 %vm311_vm5, %v859_v28  ;;  %2042 = vmatprep.subr.bf16.mxu1 %v2236_v59 }
 0x35a   :  { %v2209_v57 = vpop.permute.xlu1 %2208 }
 0x35b   :  { %v2211_v63 = vunpack.i.h.bf16 %v2209_v57  ;;  %v2210_v21 = vunpack.i.l.bf16 %v2209_v57 }
 0x35c   :  { %v2214_v29 = vpop.permute.xlu0 %2213  ;;  %2043 = vmatpush3.bf16.msra.mxu1 %v2236_v59 }
 0x35d   :  { %v853_v31 = vsel %vm298_vm4, %v776_v9, %v2211_v63  ;;  %v852_v34 = vsel %vm298_vm4, %v775_v32, %v2210_v21  ;;  %v2216_v25 = vunpack.i.h.bf16 %v2214_v29  ;;  %v2215_v0 = vunpack.i.l.bf16 %v2214_v29  ;;  %2056 = vmatprep.subr.bf16.mxu1 %v2237_v27  ;;  %v1859_v32 = vld [vmem:[%s3124_s6] ss:$0 sm:$0xff] }
 0x35e   :  { %v860_v33 = vpack.c.bf16 %v853_v31, %v852_v34  ;;  %v834_v40 = vpop.permute.xlu1 %833 }
 0x35f   :  { %v855_v20 = vsel %vm298_vm4, %v778_v1, %v2216_v25  ;;  %v854_v35 = vsel %vm298_vm4, %v777_v39, %v2215_v0  ;;  %v856_v42 = vsel %vm298_vm4, %v779_v51, %v834_v40 }
 0x360   :  { %v861_v38 = vpack.c.bf16 %v855_v20, %v854_v35  ;;  %2033 = vmatmul.mubr.msk.bf16.gmra.mrb[16].mxu1 %vm311_vm5, %v860_v33  ;;  %v862_v10 = vpack.c.bf16 %v856_v42, %v856_v42 }
 0x362   :  { %2036 = vmatprep.mubr.msk.bf16.mxu1 %vm311_vm5, %v861_v38 }
 0x368   :  { %2037 = vmatmul.mubr.msk.bf16.gmra.mrb[20].mxu1 %vm311_vm5, %v862_v10 }
 0x42a   :  { %v2030_v43 = vpop.f32.mrb[12].mxu1 }
 0x42b   :  { %v963_v9 = vadd.f32 %v2030_v43, %v1859_v32  ;;  %v954_v2 = vpop.f32.mrb[13].mxu1 }
 0x42c   :  { %v955_v11 = vadd.f32 %v1859_v32, %v954_v2  ;;  %v2031_v15 = vpop.f32.mrb[14].mxu1 }
 0x42d   :  { %v966_v13 = vadd.f32 %v2031_v15, %v1859_v32  ;;  %v957_v45 = vpop.f32.mrb[15].mxu1  ;;  %v1002_v46 = vmax.f32 %v963_v9, 0.0 }
 0x42e   :  { %v958_v24 = vadd.f32 %v1859_v32, %v957_v45  ;;  %v1000_v30 = vmax.f32 %v955_v11, 0.0 }
 0x42f   :  { %v1003_v16 = vmax.f32 %v966_v13, 0.0 }
 0x430   :  { %v1001_v23 = vmax.f32 %v958_v24, 0.0 }
 0x431   :  { %v1012_v47 = vpack.c.bf16 %v1003_v16, %v1002_v46 }
 0x432   :  { %v1011_v51 = vpack.c.bf16 %v1001_v23, %v1000_v30 }
 0x433   :  { %v2034_v39 = vpop.f32.mrb[16].mxu1 }
 0x434   :  { %v979_v41 = vadd.f32 %v2034_v39, %v1859_v32  ;;  %v970_v1 = vpop.f32.mrb[17].mxu1  ;;  %2044 = vmatprep.mubr.msk.bf16.mxu1 %vm298_vm4, %v1011_v51 }
 0x435   :  { %v971_v49 = vadd.f32 %v1859_v32, %v970_v1  ;;  %v2035_v36 = vpop.f32.mrb[18].mxu1  ;;  %2045 = vmatmul.mubr.msk.bf16.vlgmr.msra.gmra.mrb[24].mxu1 %vm298_vm4, %v1012_v47 }
 0x436   :  { %v982_v52 = vadd.f32 %v2035_v36, %v1859_v32  ;;  %v973_v53 = vpop.f32.mrb[19].mxu1  ;;  %2057 = vmatpush3.bf16.msra.mxu1 %v2237_v27  ;;  %v1006_v56 = vmax.f32 %v979_v41, 0.0  ;;  %v2241_v36 = vld [vmem:[%s3129_s11 + $0x4] ss:$8 sps:$4 sm:$0xff]  }
 0x437   :  { %v974_v54 = vadd.f32 %v1859_v32, %v973_v53  ;;  %2058 = vmatprep.subr.bf16.mxu1 %v2238_v37  ;;  %v1004_v50 = vmax.f32 %v971_v49, 0.0  ;;  %v2244_v53 = vld [vmem:[%s3129_s11 + $0x14] ss:$8 sps:$4 sm:$0xff]  }
 0x438   :  { %v1007_v44 = vmax.f32 %v982_v52, 0.0  ;;  %v2239_v52 = vld [vmem:[%s3129_s11] ss:$8 sps:$4 sm:$0xff]  }
 0x439   :  { %v1005_v48 = vmax.f32 %v974_v54, 0.0  ;;  %v2242_v54 = vld [vmem:[%s3129_s11 + $0x10] ss:$8 sps:$4 sm:$0xff]  }
 0x43a   :  { %v1014_v58 = vpack.c.bf16 %v1007_v44, %v1006_v56  ;;  %2059 = vmatpush3.bf16.msra.mxu1 %v2238_v37  ;;  %v2247_v56 = vld [vmem:[%s3131_s13 + $0x4] ss:$8 sps:$4 sm:$0xff]   ;;  %v2250_v44 = vld [vmem:[%s3131_s13 + $0x14] ss:$8 sps:$4 sm:$0xff]  }
 0x43b   :  { %v1013_v60 = vpack.c.bf16 %v1005_v48, %v1004_v50  ;;  %v2038_v61 = vpop.f32.mrb[20].mxu1  ;;  %1346 = vmatprep.subr.bf16.mxu1 %v2241_v36  ;;  %1595 = vmatprep.subr.bf16.mxu0 %v2247_v56  ;;  %v2248_v50 = vld [vmem:[%s3131_s13 + $0x10] ss:$8 sps:$4 sm:$0xff]   ;;  %v2253_v48 = vld [vmem:[%s3131_s13 + $0x24] ss:$8 sps:$4 sm:$0xff]  }
 0x43c   :  { %v995_v62 = vadd.f32 %v2038_v61, %v1859_v32  ;;  %v986_v55 = vpop.f32.mrb[21].mxu1  ;;  %v2254_v61 = vld [vmem:[%s3131_s13 + $0x30] ss:$8 sps:$4 sm:$0xff]  }
 0x43d   :  { %v987_v5 = vadd.f32 %v1859_v32, %v986_v55  ;;  %v2039_v6 = vpop.f32.mrb[22].mxu1  ;;  %2048 = vmatprep.mubr.msk.bf16.mxu1 %vm298_vm4, %v1013_v60  ;;  %v2256_v60 = vld [vmem:[%s3131_s13 + $0x34] ss:$8 sps:$4 sm:$0xff]   ;;  %v2257_v55 = vld [vmem:[%s3131_s13 + $0x40] ss:$8 sps:$4 sm:$0xff]  }
 0x43e   :  { %v989_v7 = vpop.f32.mrb[23].mxu1  ;;  %2049 = vmatmul.mubr.msk.bf16.gmra.mrb[28].mxu1 %vm298_vm4, %v1014_v58  ;;  %v1010_v12 = vmax.f32 %v995_v62, 0.0  ;;  %v2251_v58 = vld [vmem:[%s3131_s13 + $0x20] ss:$8 sps:$4 sm:$0xff]   ;;  %v2259_v62 = vld [vmem:[%s3131_s13 + $0x44] ss:$8 sps:$4 sm:$0xff]  }
 0x43f   :  { %v990_v8 = vadd.f32 %v1859_v32, %v989_v7  ;;  %v1008_v14 = vmax.f32 %v987_v5, 0.0  ;;  %v2262_v5 = vld [vmem:[%s3131_s13 + $0x54] ss:$8 sps:$4 sm:$0xff]   ;;  %v2260_v6 = vld [vmem:[%s3131_s13 + $0x50] ss:$8 sps:$4 sm:$0xff]  }
 0x440   :  { %v1016_v19 = vpack.c.bf16 %v1010_v12, %v1010_v12  ;;  %v2265_v7 = vld [vmem:[%s3131_s13 + $0x64] ss:$8 sps:$4 sm:$0xff]   ;;  %v2268_v12 = vld [vmem:[%s3131_s13 + $0x74] ss:$8 sps:$4 sm:$0xff]  }
 0x441   :  { %v1009_v17 = vmax.f32 %v990_v8, 0.0  ;;  %v2263_v8 = vld [vmem:[%s3131_s13 + $0x60] ss:$8 sps:$4 sm:$0xff]  }
 0x443   :  { %v1015_v4 = vpack.c.bf16 %v1009_v17, %v1008_v14  ;;  %v2266_v14 = vld [vmem:[%s3131_s13 + $0x70] ss:$8 sps:$4 sm:$0xff]   ;;  %v2271_v17 = vld [vmem:[%s3131_s13 + $0x84] ss:$8 sps:$4 sm:$0xff]  }
 0x445   :  { %2052 = vmatprep.mubr.msk.bf16.mxu1 %vm298_vm4, %v1015_v4  ;;  %v2269_v4 = vld [vmem:[%s3131_s13 + $0x80] ss:$8 sps:$4 sm:$0xff]  }
 0x446   :  { %2053 = vmatmul.mubr.msk.bf16.gmra.mrb[32].mxu1 %vm298_vm4, %v1016_v19  ;;  %v2274_v19 = vld [vmem:[%s3131_s13 + $0x94] ss:$8 sps:$4 sm:$0xff]  }
 0x508   :  { %v2046_v59 = vpop.f32.mrb[24].mxu1 }
 0x509   :  { %v1101_v3 = vadd.f32 %v2046_v59, %v1870_v18  ;;  %v1092_v26 = vpop.f32.mrb[25].mxu1  ;;  %v2277_v59 = vld [vmem:[%s3131_s13 + $0xa4] ss:$8 sps:$4 sm:$0xff]  }
 0x50a   :  { %v1093_v28 = vadd.f32 %v1870_v18, %v1092_v26  ;;  %v2047_v57 = vpop.f32.mrb[26].mxu1  ;;  %v2280_v26 = vld [vmem:[%s3131_s13 + $0xb4] ss:$8 sps:$4 sm:$0xff]  }
 0x50b   :  { %v1104_v63 = vadd.f32 %v2047_v57, %v1870_v18  ;;  %v1095_v21 = vpop.f32.mrb[27].mxu1  ;;  %v1140_v31 = vmax.f32 %v1101_v3, 0.0  ;;  %v2275_v3 = vld [vmem:[%s3131_s13 + $0xa0] ss:$8 sps:$4 sm:$0xff]   ;;  %v2283_v57 = vld [vmem:[%s3131_s13 + $0xc4] ss:$8 sps:$4 sm:$0xff]  }
 0x50c   :  { %v1096_v29 = vadd.f32 %v1870_v18, %v1095_v21  ;;  %v1138_v25 = vmax.f32 %v1093_v28, 0.0  ;;  %v2278_v28 = vld [vmem:[%s3131_s13 + $0xb0] ss:$8 sps:$4 sm:$0xff]   ;;  %v2286_v21 = vld [vmem:[%s3131_s13 + $0xd4] ss:$8 sps:$4 sm:$0xff]  }
 0x50d   :  { %v1141_v34 = vmax.f32 %v1104_v63, 0.0  ;;  %v2281_v63 = vld [vmem:[%s3131_s13 + $0xc0] ss:$8 sps:$4 sm:$0xff]  }
 0x50e   :  { %v1139_v0 = vmax.f32 %v1096_v29, 0.0  ;;  %v2284_v29 = vld [vmem:[%s3131_s13 + $0xd0] ss:$8 sps:$4 sm:$0xff]  }
 0x50f   :  { %v1150_v33 = vpack.c.bf16 %v1141_v34, %v1140_v31  ;;  %v1879_v31 = vld [vmem:[%s3128_s10] ss:$0 sm:$0xff] }
 0x510   :  { %v1149_v20 = vpack.c.bf16 %v1139_v0, %v1138_v25 }
 0x511   :  { %v2050_v35 = vpop.f32.mrb[28].mxu1 }
 0x512   :  { %v1117_v38 = vadd.f32 %v2050_v35, %v1870_v18  ;;  %v1108_v40 = vpop.f32.mrb[29].mxu1  ;;  %2060 = vmatprep.mubr.msk.bf16.mxu1 %vm298_vm4, %v1149_v20 }
 0x513   :  { %v1109_v42 = vadd.f32 %v1870_v18, %v1108_v40  ;;  %v2051_v10 = vpop.f32.mrb[30].mxu1  ;;  %2061 = vmatmul.mubr.msk.bf16.vlgmr.msra.gmra.mrb[36].mxu1 %vm298_vm4, %v1150_v33 }
 0x514   :  { %v1120_v27 = vadd.f32 %v2051_v10, %v1870_v18  ;;  %v1111_v32 = vpop.f32.mrb[31].mxu1  ;;  %v1144_v9 = vmax.f32 %v1117_v38, 0.0  ;;  %1347 = vmatpush1.bf16.msra.mxu1 %v2239_v52 }
 0x515   :  { %v1112_v43 = vadd.f32 %v1870_v18, %v1111_v32  ;;  %v1142_v11 = vmax.f32 %v1109_v42, 0.0  ;;  %1348 = vmatprep.subr.bf16.mxu1 %v2244_v53 }
 0x516   :  { %v1145_v2 = vmax.f32 %v1120_v27, 0.0 }
 0x517   :  { %v1143_v15 = vmax.f32 %v1112_v43, 0.0 }
 0x518   :  { %v1152_v13 = vpack.c.bf16 %v1145_v2, %v1144_v9  ;;  %1349 = vmatpush1.bf16.msra.mxu1 %v2242_v54 }
 0x519   :  { %v1151_v45 = vpack.c.bf16 %v1143_v15, %v1142_v11  ;;  %v2054_v24 = vpop.f32.mrb[32].mxu1 }
 0x51a   :  { %v1133_v46 = vadd.f32 %v2054_v24, %v1870_v18  ;;  %v1124_v16 = vpop.f32.mrb[33].mxu1 }
 0x51b   :  { %v1125_v30 = vadd.f32 %v1870_v18, %v1124_v16  ;;  %v2055_v23 = vpop.f32.mrb[34].mxu1  ;;  %2064 = vmatprep.mubr.msk.bf16.mxu1 %vm298_vm4, %v1151_v45 }
 0x51c   :  { %v1127_v47 = vpop.f32.mrb[35].mxu1  ;;  %2065 = vmatmul.mubr.msk.bf16.gmra.mrb[40].mxu1 %vm298_vm4, %v1152_v13  ;;  %v1148_v39 = vmax.f32 %v1133_v46, 0.0 }
 0x51d   :  { %v1128_v51 = vadd.f32 %v1870_v18, %v1127_v47  ;;  %v1146_v37 = vmax.f32 %v1125_v30, 0.0  ;;  %v2272_v18 = vld [vmem:[%s3131_s13 + $0x90] ss:$8 sps:$4 sm:$0xff]  }
 0x51e   :  { %v1154_v49 = vpack.c.bf16 %v1148_v39, %v1148_v39 }
 0x51f   :  { %v1147_v41 = vmax.f32 %v1128_v51, 0.0 }
 0x521   :  { %v1153_v1 = vpack.c.bf16 %v1147_v41, %v1146_v37 }
 0x523   :  { %2068 = vmatprep.mubr.msk.bf16.mxu1 %vm298_vm4, %v1153_v1 }
 0x524   :  { %2069 = vmatmul.mubr.msk.bf16.gmra.mrb[44].mxu1 %vm298_vm4, %v1154_v49 }
 0x525   :  { %1378 = vmatprep.mubr.bf16.mxu1 %v2336_v22  ;;  %v2245_v22 = vld [vmem:[%s3131_s13] ss:$8 sps:$4 sm:$0xff]  }
 0x526   :  { %1596 = vmatpush1.bf16.msra.mxu0 %v2245_v22 }
 0x527   :  { %1597 = vmatprep.subr.bf16.mxu0 %v2250_v44 }
 0x52a   :  { %1598 = vmatpush1.bf16.msra.mxu0 %v2248_v50 }
 0x52b   :  { %1599 = vmatprep.subr.bf16.mxu0 %v2253_v48 }
 0x52e   :  { %1600 = vmatpush1.bf16.msra.mxu0 %v2251_v58 }
 0x52f   :  { %1601 = vmatprep.subr.bf16.mxu0 %v2256_v60 }
 0x532   :  { %1602 = vmatpush1.bf16.msra.mxu0 %v2254_v61 }
 0x533   :  { %1603 = vmatprep.subr.bf16.mxu0 %v2259_v62 }
 0x536   :  { %1604 = vmatpush1.bf16.msra.mxu0 %v2257_v55 }
 0x537   :  { %1605 = vmatprep.subr.bf16.mxu0 %v2262_v5 }
 0x53a   :  { %1606 = vmatpush1.bf16.msra.mxu0 %v2260_v6 }
 0x53b   :  { %1607 = vmatprep.subr.bf16.mxu0 %v2265_v7 }
 0x53e   :  { %1608 = vmatpush1.bf16.msra.mxu0 %v2263_v8  ;;  %v2289_v8 = vld [vmem:[%s3131_s13 + $0xe4] ss:$8 sps:$4 sm:$0xff]  }
 0x53f   :  { %1609 = vmatprep.subr.bf16.mxu0 %v2268_v12  ;;  %v2287_v12 = vld [vmem:[%s3131_s13 + $0xe0] ss:$8 sps:$4 sm:$0xff]  }
 0x542   :  { %1610 = vmatpush1.bf16.msra.mxu0 %v2266_v14  ;;  %v2292_v14 = vld [vmem:[%s3131_s13 + $0xf4] ss:$8 sps:$4 sm:$0xff]  }
 0x543   :  { %1611 = vmatprep.subr.bf16.mxu0 %v2271_v17  ;;  %v2290_v17 = vld [vmem:[%s3131_s13 + $0xf0] ss:$8 sps:$4 sm:$0xff]  }
 0x546   :  { %1612 = vmatpush1.bf16.msra.mxu0 %v2269_v4  ;;  %v2293_v4 = vld [vmem:[%s3133_s15 + $0x40] sm:$0xff]  }
 0x547   :  { %1613 = vmatprep.subr.bf16.mxu0 %v2274_v19  ;;  %v1313_v19 = vlaneseq }
 0x54a   :  { %1614 = vmatpush1.bf16.msra.mxu0 %v2272_v18  ;;  %v1314_v18 = vshrl.u32 %v1313_v19, 7 }
 0x54b   :  { %1615 = vmatprep.subr.bf16.mxu0 %v2277_v59 }
 0x54c   :  { %v1315_v59 = vsub.s32 0, %v1314_v18 }
 0x54e   :  { %1616 = vmatpush1.bf16.msra.mxu0 %v2275_v3  ;;  %v1311_v3 = vld [vmem:[%s3130_s12] sm:$0x3] }
 0x54f   :  { %1617 = vmatprep.subr.bf16.mxu0 %v2280_v26  ;;  %v1319_v26 = vsub.s32 1, %v1314_v18 }
 0x552   :  { %1618 = vmatpush1.bf16.msra.mxu0 %v2278_v28  ;;  %v1316_v28 = vrot.slane %v1311_v3, %v1315_v59 }
 0x553   :  { %1619 = vmatprep.subr.bf16.mxu0 %v2283_v57  ;;  %v1320_v57 = vrot.slane %v1311_v3, %v1319_v26 }
 0x556   :  { %1620 = vmatpush1.bf16.msra.mxu0 %v2281_v63 }
 0x557   :  { %1621 = vmatprep.subr.bf16.mxu0 %v2286_v21 }
 0x55a   :  { %1622 = vmatpush1.bf16.msra.mxu0 %v2284_v29 }
 0x55b   :  { %1623 = vmatprep.subr.bf16.mxu0 %v2289_v8 }
 0x55e   :  { %1624 = vmatpush1.bf16.msra.mxu0 %v2287_v12 }
 0x55f   :  { %1625 = vmatprep.subr.bf16.mxu0 %v2292_v14 }
 0x562   :  { %1626 = vmatpush1.bf16.msra.mxu0 %v2290_v17 }
 0x563   :  { %1978 = vmatprep.subr.bf16.mxu0 %v2293_v4 }
 0x5e6   :  { %v2062_v34 = vpop.f32.mrb[36].mxu1 }
 0x5e7   :  { %v1230_v25 = vpop.f32.mrb[37].mxu1 }
 0x5e8   :  { %v1231_v0 = vadd.f32 %v1879_v31, %v1230_v25  ;;  %v2063_v33 = vpop.f32.mrb[38].mxu1 }
 0x5e9   :  { %v1233_v20 = vpop.f32.mrb[39].mxu1 }
 0x5ea   :  { %v1234_v35 = vadd.f32 %v1879_v31, %v1233_v20  ;;  %v1270_v38 = vsel %vm298_vm4, %v1231_v0, 0.0 }
 0x5ec   :  { %v1272_v40 = vsel %vm1271_vm8, %v1234_v35, 0.0  ;;  %v2294_v35 = vld [vmem:[%s3133_s15] sm:$0xff]  }
 0x5ed   :  { %v1273_v42 = vadd.f32 %v1272_v40, %v1270_v38  ;;  %v2295_v40 = vld [vmem:[%s3133_s15 + $0x48] sm:$0xff]  }
 0x5ef   :  { %v1274_v10 = vrot.slane %v1273_v42, 4  ;;  %v2066_v27 = vpop.f32.mrb[40].mxu1 }
 0x5f0   :  { %v1244_v32 = vpop.f32.mrb[41].mxu1  ;;  %v2298_v27 = vld [vmem:[%s3133_s15 + $0x10] sm:$0xff]  }
 0x5f1   :  { %v1275_v43 = vadd.f32 %v1274_v10, %v1273_v42  ;;  %v1245_v9 = vadd.f32 %v1879_v31, %v1244_v32  ;;  %v2067_v2 = vpop.f32.mrb[42].mxu1  ;;  %v2296_v42 = vld [vmem:[%s3133_s15 + $0x8] sm:$0xff]   ;;  %v2297_v10 = vld [vmem:[%s3133_s15 + $0x50] sm:$0xff]   ;;  %v2299_v32 = vld [vmem:[%s3133_s15 + $0x58] sm:$0xff]  }
 0x5f2   :  { %v1247_v11 = vpop.f32.mrb[43].mxu1  ;;  %v2302_v2 = vld [vmem:[%s3133_s15 + $0x20] sm:$0xff]  }
 0x5f3   :  { %v1248_v15 = vadd.f32 %v1879_v31, %v1247_v11  ;;  %v1276_v13 = vrot.slane %v1275_v43, 2  ;;  %v1282_v45 = vsel %vm298_vm4, %v1245_v9, 0.0  ;;  %v2301_v9 = vld [vmem:[%s3133_s15 + $0x60] sm:$0xff]   ;;  %v2303_v11 = vld [vmem:[%s3133_s15 + $0x68] sm:$0xff]  }
 0x5f5   :  { %v1283_v24 = vsel %vm298_vm4, %v1248_v15, 0.0  ;;  %v1277_v30 = vadd.f32 %v1276_v13, %v1275_v43  ;;  %v2300_v43 = vld [vmem:[%s3133_s15 + $0x18] sm:$0xff]   ;;  %v2304_v15 = vld [vmem:[%s3133_s15 + $0x28] sm:$0xff]   ;;  %v2305_v13 = vld [vmem:[%s3133_s15 + $0x70] sm:$0xff]  }
 0x5f6   :  { %v1284_v46 = vadd.f32 %v1283_v24, %v1282_v45  ;;  %v2306_v45 = vld [vmem:[%s3133_s15 + $0x30] sm:$0xff]   ;;  %v2307_v24 = vld [vmem:[%s3133_s15 + $0x78] sm:$0xff]  }
 0x5f7   :  { %v2070_v16 = vpop.f32.mrb[44].mxu1  ;;  %v1278_v49 = vrot.slane %v1277_v30, 1 }
 0x5f8   :  { %v1285_v23 = vrot.slane %v1284_v46, 4  ;;  %v1258_v47 = vpop.f32.mrb[45].mxu1  ;;  %v1423_v16 = vld [vmem:[%s3132_s14] sm:$0x3]  ;;  %s2337_s14 = smov [#allocation2]  }
 0x5f9   :  { %v1259_v51 = vadd.f32 %v1879_v31, %v1258_v47  ;;  %v2071_v39 = vpop.f32.mrb[46].mxu1  ;;  %v1279_v22 = vadd.f32 %v1278_v49, %v1277_v30  ;;  %v1428_v30 = vrot.slane %v1423_v16, %v1315_v59  ;;  %s1823_s1 = sshll.u32 %s2337_s14, 4  ;;  %s1824_s1 = int_to_ptr.vmem [resolvable:$true] %s1823_s1 }
 0x5fa   :  { %v1286_v37 = vadd.f32 %v1285_v23, %v1284_v46  ;;  %v1261_v41 = vpop.f32.mrb[47].mxu1  ;;  %v2308_v46 = vld [vmem:[%s3133_s15 + $0x38] sm:$0xff]   ;;  %v1432_v23 = vrot.slane %v1423_v16, %v1319_v26  ;;  %s2309_s20 = scalar_lea.vmem %s1824_s1, 64  ;;  %p2314_p1 = scmp.lt.s32.totalorder %s1824_s1, %s1824_s1 }
 0x5fb   :  { %v1294_v1 = vsel %vm1293_vm9, %v1259_v51, 0.0  ;;  %v1281_v58 = vmul.f32 0.1, %v1279_v22  ;;  %v1925_v22 = vld [vmem:[%s3134_s16] ss:$0 sm:$0xff]  ;;  %p2310_p0 = scmp.ne.s32.totalorder %s1824_s1, %s2309_s20  ;;  %p2315_p2 = scmp.lt.s32.totalorder %s2309_s20, %s2309_s20 }
 0x5fc   :  { %v1287_v36 = vrot.slane %v1286_v37, 2  ;;  %v1295_v52 = vrot.slane %v1294_v1, 4 }
 0x5fd   :  { %p2316_p3 = por %p2315_p2, %p2314_p1 }
 0x5fe   :  { %v1288_v53 = vadd.f32 %v1287_v36, %v1286_v37  ;;  %v1296_v54 = vadd.f32 %v1295_v52, %v1294_v1 }
 0x5ff   :  { %p2317_p4 = pnand %p2316_p3, %p2310_p0 }
 0x600   :  { %v1289_v56 = vrot.slane %v1288_v53, 1  ;;  %v1297_v44 = vrot.slane %v1296_v54, 2 }
 0x602   :  { %v1290_v50 = vadd.f32 %v1289_v56, %v1288_v53  ;;  %v1298_v48 = vadd.f32 %v1297_v44, %v1296_v54 }
 0x604   :  { %v1292_v60 = vmul.f32 0.0625, %v1290_v50  ;;  %v1299_v61 = vrot.slane %v1298_v48, 1 }
 0x606   :  { %v1304_v62 = vsel %vm1303_vm10, %v1281_v58, %v1292_v60  ;;  %v1300_v55 = vadd.f32 %v1299_v61, %v1298_v48 }
 0x608   :  { %v1302_v5 = vmul.f32 0.16666667, %v1300_v55 }
 0x60a   :  { %v1305_v6 = vsel %vm791_vm7, %v1304_v62, %v1302_v5 }
 0x60b   :  { %v1306_v7 = vpack.c.bf16 %v1305_v6, %v1305_v6 }
 0x60d   :  { %1892 = vmatmul.mubr.msk.bf16.vlgmr.msra.gmra.mrb[48].mxu1 %vm298_vm4, %v1306_v7 }
 0x6e0   :  { %v1380_v63 = vpop.f32.mrb[48].mxu1 }
 0x6e1   :  { %v1381_v21 = vadd.f32 %v1380_v63, %v1316_v28  ;;  %v1382_v29 = vpop.f32.mrb[49].mxu1 }
 0x6e2   :  { %v1383_v31 = vadd.f32 %v1382_v29, %v1320_v57  ;;  %v1384_v34 = vpop.f32.mrb[50].mxu1 }
 0x6e3   :  { %v1387_v25 = vmax.f32 %v1381_v21, 0.0  ;;  %v1385_v0 = vpop.f32.mrb[51].mxu1 }
 0x6e4   :  { %v1388_v33 = vmax.f32 %v1383_v31, 0.0 }
 0x6e5   :  { %v1389_v38 = vpack.c.bf16 %v1387_v25, %v1387_v25 }
 0x6e6   :  { %v1390_v20 = vpack.c.bf16 %v1388_v33, %v1388_v33 }
 0x6e8   :  { %1627 = vmatprep.mubr.bf16.mxu0 %v1390_v20 }
 0x6e9   :  { %1628 = vmatmul.mubr.bf16.vlgmr.msra.gmra.mrb[24].mxu0 %v1389_v38 }
 0x6ea   :  { %1979 = vmatpush3.bf16.msra.mxu0 %v2294_v35 }
 0x6eb   :  { %1980 = vmatprep.subr.bf16.mxu0 %v2295_v40 }
 0x6ee   :  { %1981 = vmatpush3.bf16.msra.mxu0 %v2296_v42 }
 0x6ef   :  { %1982 = vmatprep.subr.bf16.mxu0 %v2297_v10 }
 0x6f2   :  { %1983 = vmatpush3.bf16.msra.mxu0 %v2298_v27 }
 0x6f3   :  { %1984 = vmatprep.subr.bf16.mxu0 %v2299_v32 }
 0x6f6   :  { %1985 = vmatpush3.bf16.msra.mxu0 %v2300_v43 }
 0x6f7   :  { %1986 = vmatprep.subr.bf16.mxu0 %v2301_v9 }
 0x6fa   :  { %1987 = vmatpush3.bf16.msra.mxu0 %v2302_v2 }
 0x6fb   :  { %1988 = vmatprep.subr.bf16.mxu0 %v2303_v11 }
 0x6fe   :  { %1989 = vmatpush3.bf16.msra.mxu0 %v2304_v15 }
 0x6ff   :  { %1990 = vmatprep.subr.bf16.mxu0 %v2305_v13 }
 0x702   :  { %1991 = vmatpush3.bf16.msra.mxu0 %v2306_v45 }
 0x703   :  { %1992 = vmatprep.subr.bf16.mxu0 %v2307_v24 }
 0x706   :  { %1993 = vmatpush3.bf16.msra.mxu0 %v2308_v46 }
 0x7bc   :  { %v1629_v47 = vpop.f32.mrb[24].mxu0 }
 0x7bd   :  { %v1630_v51 = vadd.f32 %v1629_v47, %v1428_v30  ;;  %v1631_v39 = vpop.f32.mrb[25].mxu0 }
 0x7be   :  { %v1632_v37 = vadd.f32 %v1631_v39, %v1432_v23  ;;  %v1633_v41 = vpop.f32.mrb[26].mxu0 }
 0x7bf   :  { %v1636_v1 = vmax.f32 %v1630_v51, 0.0  ;;  %v1634_v49 = vpop.f32.mrb[27].mxu0 }
 0x7c0   :  { %v1637_v36 = vmax.f32 %v1632_v37, 0.0 }
 0x7c1   :  { %v1638_v53 = vpack.c.bf16 %v1636_v1, %v1636_v1 }
 0x7c2   :  { %v1639_v52 = vpack.c.bf16 %v1637_v36, %v1637_v36 }
 0x7c4   :  { %1807 = vmatprep.mubr.bf16.mxu0 %v1639_v52 }
 0x7c5   :  { %1808 = vmatmul.mubr.bf16.vlgmr.msra.gmra.mrb[28].mxu0 %v1638_v53 }
 0x898   :  { %v1994_v54 = vpop.f32.mrb[28].mxu0 }
 0x899   :  { %v1995_v56 = vpop.f32.mrb[29].mxu0 }
 0x89a   :  { %v1996_v44 = vadd.f32 %v1995_v56, %v1994_v54  ;;  %v1997_v50 = vpop.f32.mrb[30].mxu0 }
 0x89b   :  { %v1998_v48 = vpop.f32.mrb[31].mxu0 }
 0x89c   :  { %v1810_v58 = vadd.f32 %v1996_v44, %v1925_v22 }
 0x89e   :  { %1816 = vst.msk [vmem:[#allocation2] sm:$0x7] %vm1815_vm11, %v1810_v58 }
 0x89f   :  { %2320 = shalt.err (!%p2317_p4)
}
 0x8a0   :  { %s2321_s16 = scalar_lea.hbm %s3135_s17, 64 }
 0x8a1   :  { %p2322_p5 = scmp.ne.s32.totalorder %s3135_s17, %s2321_s16  ;;  %p2325_p6 = scmp.lt.u32.totalorder %s2321_s16, %s3135_s17 }
 0x8a3   :  { %p2327_p7 = pnand %p2325_p6, %p2322_p5 }
 0x8a5   :  { %2330 = shalt.err (!%p2327_p7)
}
 0x8a6   :  { %1826 = dma.vmem_to_hbm [thread:$0]  %s1824_s1, 64, %s3135_s17, [#allocation3]  }
 0x8a7   :  { %2331 = dma.done.wait [#allocation3], 64  }
 0x8a8   :  { %2332 = vsyncadd [#allocation3], 4294967232 }
 0x8a9   :  { %1830 = vsyncpa [#allocation3], 1 }

</bundles_post_ra>
